<compile_context>
chip_gen: v7x
topology: tpu7x:2x2x1
jax: 0.10.0
libtpu: 0.0.40
codegen_flags: <defaults>
</compile_context>

<pallas_src>
import math
import functools

import jax
import jax.numpy as jnp
from jax.experimental import pallas as pl
from jax.experimental.pallas import tpu as pltpu

ALPHA = 0.2            # LeakyReLU negative slope (GAT default alpha=0.2)
NEG_BIG = -9e15        # same masking constant as the PyTorch code


def _gat_layer_kernel(h_ref, adj_ref, w_ref, a1_ref, a2t_ref, o_ref, *,
                      num_heads, f_out, residual):
    """One batch element, all heads. All hot-path compute in-kernel."""
    h = h_ref[0]                                   # (N, F_in) f32
    # adjacency arrives as int8 (bandwidth); widen once, mask in f32 (v5e-safe)
    mask = adj_ref[0].astype(jnp.float32) > 0.0    # (N, N) bool

    # Wh for all heads in one MXU matmul: (N, F_in) @ (F_in, H*F_out)
    h_bf = h.astype(jnp.bfloat16)
    wh = jnp.dot(h_bf, w_ref[...], preferred_element_type=jnp.float32)   # (N, HF) f32
    wh_bf = wh.astype(jnp.bfloat16)
    # F.dropout(Wh): identity in inference mode

    # Attention-score projections on the MXU (block-diagonal per-head a1/a2):
    #   s1[:, hd]  = Wh_hd @ a1_hd   (column form, per query node)
    #   s2t[hd, :] = a2_hd @ Wh_hd^T (row form, per key node; trans_b dot, no
    #                                 materialized transpose)
    s1 = jnp.dot(wh_bf, a1_ref[...], preferred_element_type=jnp.float32)      # (N, H)
    s2t = jax.lax.dot_general(a2t_ref[...], wh_bf,
                              dimension_numbers=(((1,), (1,)), ((), ())),
                              preferred_element_type=jnp.float32)             # (H, N)

    outs = []
    for hd in range(num_heads):                    # static, unrolled (H is small)
        # e[i, j] = leakyrelu(wh1_i + wh2_j)
        e = s1[:, hd:hd + 1] + s2t[hd:hd + 1, :]                  # (N, N)
        e = jnp.where(e > 0, e, ALPHA * e)                        # LeakyReLU

        # mask by adjacency, softmax over keys
        logits = jnp.where(mask, e, NEG_BIG)
        m = jnp.max(logits, axis=-1, keepdims=True)
        p = jnp.exp(logits - m)
        inv = pl.reciprocal(jnp.sum(p, axis=-1, keepdims=True), approx=True)
        att = p * inv
        # F.dropout(attention): identity in inference mode

        # h'_hd = att @ Wh_hd, then ELU (concat=True branch)
        wh_h = wh_bf[:, hd * f_out:(hd + 1) * f_out]              # (N, F_out) bf16
        hp = jnp.dot(att.astype(jnp.bfloat16), wh_h,
                     preferred_element_type=jnp.float32)          # (N, F_out) f32
        # ELU(alpha=1); exp arg clamped to <=0 so the discarded branch of the
        # select never overflows (numerically identical where it is used).
        outs.append(jnp.where(hp > 0, hp, jnp.exp(jnp.minimum(hp, 0.0)) - 1.0))

    out = jnp.concatenate(outs, axis=-1)                          # (N, H*F_out)
    if residual:                                                  # fused residual add
        out = out + h
    o_ref[0] = out.astype(o_ref.dtype)


def gat_layer(h, adj_i8, W, a, *, residual=True):
    """Multi-head GAT layer. grid=(B,), heads computed (and concatenated) in-kernel."""
    B, N, F_in = h.shape
    H, _, F_out = W.shape
    HF = H * F_out
    if residual:
        assert F_in == HF, "residual connection requires F_in == H * F_out"

    # Head-concatenated projection: W_all[:, hd*F_out + f] = W[hd, :, f]
    W_all = jnp.transpose(W, (1, 0, 2)).reshape(F_in, HF).astype(jnp.bfloat16)

    # Block-diagonal score projections so wh1/wh2 become MXU matmuls.
    eye = jnp.eye(H, dtype=W.dtype)
    A1 = (a[:, 0, :, None] * eye[:, None, :]).reshape(HF, H).astype(jnp.bfloat16)    # (HF, H)
    A2T = (a[:, 1, :, None] * eye[:, None, :]).reshape(HF, H).T.astype(jnp.bfloat16)  # (H, HF)

    kernel = functools.partial(_gat_layer_kernel,
                               num_heads=H, f_out=F_out, residual=residual)

    return pl.pallas_call(
        kernel,
        out_shape=jax.ShapeDtypeStruct((B, N, HF), h.dtype),
        grid_spec=pltpu.PrefetchScalarGridSpec(
            num_scalar_prefetch=0,
            grid=(B,),
            in_specs=[
                pl.BlockSpec((1, N, F_in), lambda b: (b, 0, 0)),   # h
                pl.BlockSpec((1, N, N),    lambda b: (b, 0, 0)),   # adj (int8)
                pl.BlockSpec((F_in, HF),   lambda b: (0, 0)),      # W_all (whole)
                pl.BlockSpec((HF, H),      lambda b: (0, 0)),      # A1    (whole)
                pl.BlockSpec((H, HF),      lambda b: (0, 0)),      # A2^T  (whole)
            ],
            out_specs=pl.BlockSpec((1, N, HF), lambda b: (b, 0, 0)),
        ),
        compiler_params=pltpu.CompilerParams(
            dimension_semantics=("parallel",),          # batch axis shards across TCs (v7x)
            vmem_limit_bytes=48 * 1024 * 1024,          # headroom under v7x 64 MiB VMEM
        ),
    )(h, adj_i8, W_all, A1, A2T)


def multilayer_gat(h, adj_i8, params, residual=True):
    """Stack of GAT layers (eval mode: every nn.Dropout is identity)."""
    for (W, a) in params:
        h = gat_layer(h, adj_i8, W, a, residual=residual)  # residual fused in-kernel
    return h


def _xavier_uniform(key, shape, gain, fan_in, fan_out):
    limit = gain * math.sqrt(6.0 / (fan_in + fan_out))
    return jax.random.uniform(key, shape, jnp.float32, -limit, limit)


def init_params(key, nfeat, nhid, nlayers, nheads):
    """Deterministic parameter init mirroring the per-head GAT parameter shapes."""
    assert nhid % nheads == 0
    f_out = nhid // nheads
    gain = 1.414
    params = []
    in_dims = [nfeat] + [nhid] * (nlayers - 1)
    for f_in in in_dims:
        key, kw, ka = jax.random.split(key, 3)
        W = _xavier_uniform(kw, (nheads, f_in, f_out), gain, f_in, f_out)
        a = _xavier_uniform(ka, (nheads, 2 * f_out, 1), gain, 2 * f_out, 1)
        a = a.reshape(nheads, 2, f_out)
        params.append((W, a))
    return params


if __name__ == "__main__":
    B, N = 2, 16
    nfeat = 32       # == nhid so the residual connection is shape-valid
    nhid = 32
    nheads = 4
    nlayers = 2

    key = jax.random.PRNGKey(0)
    kh, kadj, kp = jax.random.split(key, 3)

    h = jax.random.normal(kh, (B, N, nfeat), dtype=jnp.float32)

    # adjacency with self-loops, stored as int8 (kernel tests nonzero)
    adj_f = (jax.random.uniform(kadj, (B, N, N)) > 0.5).astype(jnp.float32)
    adj_f = jnp.maximum(adj_f, jnp.eye(N, dtype=jnp.float32)[None])
    adj = adj_f.astype(jnp.int8)

    params = init_params(kp, nfeat, nhid, nlayers, nheads)

    out = jax.jit(multilayer_gat, static_argnames=("residual",))(
        h, adj, params, residual=True)
    jax.block_until_ready(out)
    assert out.shape == (B, N, nhid)
    print("KERNEL_OK")
</pallas_src>

<mosaic_0001>
module attributes {stable_mosaic.version = 11 : i64} {
  func.func @_gat_layer_kernel(%arg0: i32, %arg1: memref<1x16x32xf32, #tpu.memory_space<vmem>>, %arg2: memref<1x16x16xi8, #tpu.memory_space<vmem>>, %arg3: memref<32x32xbf16, #tpu.memory_space<vmem>>, %arg4: memref<32x4xbf16, #tpu.memory_space<vmem>>, %arg5: memref<4x32xbf16, #tpu.memory_space<vmem>>, %arg6: memref<1x16x32xf32, #tpu.memory_space<vmem>>) attributes {dimension_semantics = [#tpu.dimension_semantics<parallel>], iteration_bounds = array<i64: 2>, scalar_prefetch = 0 : i64, scratch_operands = 0 : i64, tpu.core_type = #tpu.core_type<tc>, window_params = [{transform_indices = @transform_0, window_bounds = array<i64: 1, 16, 32>}, {transform_indices = @transform_1, window_bounds = array<i64: 1, 16, 16>}, {pipeline_mode = #tpu.pipeline_mode<synchronous>, transform_indices = @transform_2, window_bounds = array<i64: 32, 32>}, {pipeline_mode = #tpu.pipeline_mode<synchronous>, transform_indices = @transform_3, window_bounds = array<i64: 32, 4>}, {pipeline_mode = #tpu.pipeline_mode<synchronous>, transform_indices = @transform_4, window_bounds = array<i64: 4, 32>}, {transform_indices = @transform_5, window_bounds = array<i64: 1, 16, 32>}]} {
    %c0 = arith.constant 0 : index
    %c0_0 = arith.constant 0 : index
    %c0_1 = arith.constant 0 : index
    %0 = vector.load %arg1[%c0, %c0_0, %c0_1] : memref<1x16x32xf32, #tpu.memory_space<vmem>>, vector<1x16x32xf32>
    %1 = vector.shape_cast %0 : vector<1x16x32xf32> to vector<16x32xf32>
    %c0_2 = arith.constant 0 : index
    %c0_3 = arith.constant 0 : index
    %c0_4 = arith.constant 0 : index
    %2 = vector.load %arg2[%c0_2, %c0_3, %c0_4] : memref<1x16x16xi8, #tpu.memory_space<vmem>>, vector<1x16x16xi8>
    %3 = vector.shape_cast %2 : vector<1x16x16xi8> to vector<16x16xi8>
    %4 = arith.sitofp %3 : vector<16x16xi8> to vector<16x16xf32>
    %cst = arith.constant 0.000000e+00 : f32
    %5 = vector.broadcast %cst : f32 to vector<16x16xf32>
    %6 = arith.cmpf ogt, %4, %5 : vector<16x16xf32>
    %7 = arith.truncf %1 : vector<16x32xf32> to vector<16x32xbf16>
    %c0_5 = arith.constant 0 : index
    %c0_6 = arith.constant 0 : index
    %8 = vector.load %arg3[%c0_5, %c0_6] : memref<32x32xbf16, #tpu.memory_space<vmem>>, vector<32x32xbf16>
    %cst_7 = arith.constant dense<0.000000e+00> : vector<16x32xf32>
    %9 = tpu.matmul %7, %8, %cst_7 {dimension_numbers = #tpu.dot_dimension_numbers<[1], [0], [0], [1], [0, 0, 1, 1], [], []>} : vector<16x32xbf16>, vector<32x32xbf16>, vector<16x32xf32> -> vector<16x32xf32>
    %10 = arith.truncf %9 : vector<16x32xf32> to vector<16x32xbf16>
    %c0_8 = arith.constant 0 : index
    %c0_9 = arith.constant 0 : index
    %11 = vector.load %arg4[%c0_8, %c0_9] : memref<32x4xbf16, #tpu.memory_space<vmem>>, vector<32x4xbf16>
    %cst_10 = arith.constant dense<0.000000e+00> : vector<16x4xf32>
    %12 = tpu.matmul %10, %11, %cst_10 {dimension_numbers = #tpu.dot_dimension_numbers<[1], [0], [0], [1], [0, 0, 1, 1], [], []>} : vector<16x32xbf16>, vector<32x4xbf16>, vector<16x4xf32> -> vector<16x4xf32>
    %c0_11 = arith.constant 0 : index
    %c0_12 = arith.constant 0 : index
    %13 = vector.load %arg5[%c0_11, %c0_12] : memref<4x32xbf16, #tpu.memory_space<vmem>>, vector<4x32xbf16>
    %cst_13 = arith.constant dense<0.000000e+00> : vector<4x16xf32>
    %14 = tpu.matmul %13, %10, %cst_13 {dimension_numbers = #tpu.dot_dimension_numbers<[1], [1], [0], [0], [0, 0, 1, 0], [], []>} : vector<4x32xbf16>, vector<16x32xbf16>, vector<4x16xf32> -> vector<4x16xf32>
    %15 = vector.extract_strided_slice %12 {offsets = [0, 0], sizes = [16, 1], strides = [1, 1]} : vector<16x4xf32> to vector<16x1xf32>
    %16 = vector.extract_strided_slice %14 {offsets = [0, 0], sizes = [1, 16], strides = [1, 1]} : vector<4x16xf32> to vector<1x16xf32>
    %17 = vector.broadcast %15 : vector<16x1xf32> to vector<16x16xf32>
    %18 = vector.broadcast %16 : vector<1x16xf32> to vector<16x16xf32>
    %19 = arith.addf %17, %18 : vector<16x16xf32>
    %cst_14 = arith.constant 0.000000e+00 : f32
    %20 = vector.broadcast %cst_14 : f32 to vector<16x16xf32>
    %21 = arith.cmpf ogt, %19, %20 : vector<16x16xf32>
    %cst_15 = arith.constant 2.000000e-01 : f32
    %22 = vector.broadcast %cst_15 : f32 to vector<16x16xf32>
    %23 = arith.mulf %22, %19 : vector<16x16xf32>
    %24 = arith.select %21, %19, %23 : vector<16x16xi1>, vector<16x16xf32>
    %cst_16 = arith.constant -9.000000e+15 : f32
    %25 = vector.broadcast %cst_16 : f32 to vector<16x16xf32>
    %26 = arith.select %6, %24, %25 : vector<16x16xi1>, vector<16x16xf32>
    %cst_17 = arith.constant dense<0xFF800000> : vector<16xf32>
    %27 = vector.multi_reduction <maximumf>, %26, %cst_17 [1] : vector<16x16xf32> to vector<16xf32>
    %28 = vector.shape_cast %27 : vector<16xf32> to vector<16x1xf32>
    %29 = vector.broadcast %28 : vector<16x1xf32> to vector<16x16xf32>
    %30 = arith.subf %26, %29 : vector<16x16xf32>
    %31 = math.exp %30 : vector<16x16xf32>
    %cst_18 = arith.constant dense<0.000000e+00> : vector<16xf32>
    %32 = vector.multi_reduction <add>, %31, %cst_18 [1] : vector<16x16xf32> to vector<16xf32>
    %33 = vector.shape_cast %32 : vector<16xf32> to vector<16x1xf32>
    %34 = tpu.reciprocal %33 {approx = true} : vector<16x1xf32> -> vector<16x1xf32>
    %35 = vector.broadcast %34 : vector<16x1xf32> to vector<16x16xf32>
    %36 = arith.mulf %31, %35 : vector<16x16xf32>
    %37 = vector.extract_strided_slice %10 {offsets = [0, 0], sizes = [16, 8], strides = [1, 1]} : vector<16x32xbf16> to vector<16x8xbf16>
    %38 = arith.truncf %36 : vector<16x16xf32> to vector<16x16xbf16>
    %cst_19 = arith.constant dense<0.000000e+00> : vector<16x8xf32>
    %39 = tpu.matmul %38, %37, %cst_19 {dimension_numbers = #tpu.dot_dimension_numbers<[1], [0], [0], [1], [0, 0, 1, 1], [], []>} : vector<16x16xbf16>, vector<16x8xbf16>, vector<16x8xf32> -> vector<16x8xf32>
    %cst_20 = arith.constant 0.000000e+00 : f32
    %40 = vector.broadcast %cst_20 : f32 to vector<16x8xf32>
    %41 = arith.cmpf ogt, %39, %40 : vector<16x8xf32>
    %cst_21 = arith.constant 0.000000e+00 : f32
    %42 = vector.broadcast %cst_21 : f32 to vector<16x8xf32>
    %43 = arith.minimumf %39, %42 : vector<16x8xf32>
    %44 = math.exp %43 : vector<16x8xf32>
    %cst_22 = arith.constant 1.000000e+00 : f32
    %45 = vector.broadcast %cst_22 : f32 to vector<16x8xf32>
    %46 = arith.subf %44, %45 : vector<16x8xf32>
    %47 = arith.select %41, %39, %46 : vector<16x8xi1>, vector<16x8xf32>
    %48 = vector.extract_strided_slice %12 {offsets = [0, 1], sizes = [16, 1], strides = [1, 1]} : vector<16x4xf32> to vector<16x1xf32>
    %49 = vector.extract_strided_slice %14 {offsets = [1, 0], sizes = [1, 16], strides = [1, 1]} : vector<4x16xf32> to vector<1x16xf32>
    %50 = vector.broadcast %48 : vector<16x1xf32> to vector<16x16xf32>
    %51 = vector.broadcast %49 : vector<1x16xf32> to vector<16x16xf32>
    %52 = arith.addf %50, %51 : vector<16x16xf32>
    %cst_23 = arith.constant 0.000000e+00 : f32
    %53 = vector.broadcast %cst_23 : f32 to vector<16x16xf32>
    %54 = arith.cmpf ogt, %52, %53 : vector<16x16xf32>
    %cst_24 = arith.constant 2.000000e-01 : f32
    %55 = vector.broadcast %cst_24 : f32 to vector<16x16xf32>
    %56 = arith.mulf %55, %52 : vector<16x16xf32>
    %57 = arith.select %54, %52, %56 : vector<16x16xi1>, vector<16x16xf32>
    %cst_25 = arith.constant -9.000000e+15 : f32
    %58 = vector.broadcast %cst_25 : f32 to vector<16x16xf32>
    %59 = arith.select %6, %57, %58 : vector<16x16xi1>, vector<16x16xf32>
    %cst_26 = arith.constant dense<0xFF800000> : vector<16xf32>
    %60 = vector.multi_reduction <maximumf>, %59, %cst_26 [1] : vector<16x16xf32> to vector<16xf32>
    %61 = vector.shape_cast %60 : vector<16xf32> to vector<16x1xf32>
    %62 = vector.broadcast %61 : vector<16x1xf32> to vector<16x16xf32>
    %63 = arith.subf %59, %62 : vector<16x16xf32>
    %64 = math.exp %63 : vector<16x16xf32>
    %cst_27 = arith.constant dense<0.000000e+00> : vector<16xf32>
    %65 = vector.multi_reduction <add>, %64, %cst_27 [1] : vector<16x16xf32> to vector<16xf32>
    %66 = vector.shape_cast %65 : vector<16xf32> to vector<16x1xf32>
    %67 = tpu.reciprocal %66 {approx = true} : vector<16x1xf32> -> vector<16x1xf32>
    %68 = vector.broadcast %67 : vector<16x1xf32> to vector<16x16xf32>
    %69 = arith.mulf %64, %68 : vector<16x16xf32>
    %70 = vector.extract_strided_slice %10 {offsets = [0, 8], sizes = [16, 8], strides = [1, 1]} : vector<16x32xbf16> to vector<16x8xbf16>
    %71 = arith.truncf %69 : vector<16x16xf32> to vector<16x16xbf16>
    %cst_28 = arith.constant dense<0.000000e+00> : vector<16x8xf32>
    %72 = tpu.matmul %71, %70, %cst_28 {dimension_numbers = #tpu.dot_dimension_numbers<[1], [0], [0], [1], [0, 0, 1, 1], [], []>} : vector<16x16xbf16>, vector<16x8xbf16>, vector<16x8xf32> -> vector<16x8xf32>
    %cst_29 = arith.constant 0.000000e+00 : f32
    %73 = vector.broadcast %cst_29 : f32 to vector<16x8xf32>
    %74 = arith.cmpf ogt, %72, %73 : vector<16x8xf32>
    %cst_30 = arith.constant 0.000000e+00 : f32
    %75 = vector.broadcast %cst_30 : f32 to vector<16x8xf32>
    %76 = arith.minimumf %72, %75 : vector<16x8xf32>
    %77 = math.exp %76 : vector<16x8xf32>
    %cst_31 = arith.constant 1.000000e+00 : f32
    %78 = vector.broadcast %cst_31 : f32 to vector<16x8xf32>
    %79 = arith.subf %77, %78 : vector<16x8xf32>
    %80 = arith.select %74, %72, %79 : vector<16x8xi1>, vector<16x8xf32>
    %81 = vector.extract_strided_slice %12 {offsets = [0, 2], sizes = [16, 1], strides = [1, 1]} : vector<16x4xf32> to vector<16x1xf32>
    %82 = vector.extract_strided_slice %14 {offsets = [2, 0], sizes = [1, 16], strides = [1, 1]} : vector<4x16xf32> to vector<1x16xf32>
    %83 = vector.broadcast %81 : vector<16x1xf32> to vector<16x16xf32>
    %84 = vector.broadcast %82 : vector<1x16xf32> to vector<16x16xf32>
    %85 = arith.addf %83, %84 : vector<16x16xf32>
    %cst_32 = arith.constant 0.000000e+00 : f32
    %86 = vector.broadcast %cst_32 : f32 to vector<16x16xf32>
    %87 = arith.cmpf ogt, %85, %86 : vector<16x16xf32>
    %cst_33 = arith.constant 2.000000e-01 : f32
    %88 = vector.broadcast %cst_33 : f32 to vector<16x16xf32>
    %89 = arith.mulf %88, %85 : vector<16x16xf32>
    %90 = arith.select %87, %85, %89 : vector<16x16xi1>, vector<16x16xf32>
    %cst_34 = arith.constant -9.000000e+15 : f32
    %91 = vector.broadcast %cst_34 : f32 to vector<16x16xf32>
    %92 = arith.select %6, %90, %91 : vector<16x16xi1>, vector<16x16xf32>
    %cst_35 = arith.constant dense<0xFF800000> : vector<16xf32>
    %93 = vector.multi_reduction <maximumf>, %92, %cst_35 [1] : vector<16x16xf32> to vector<16xf32>
    %94 = vector.shape_cast %93 : vector<16xf32> to vector<16x1xf32>
    %95 = vector.broadcast %94 : vector<16x1xf32> to vector<16x16xf32>
    %96 = arith.subf %92, %95 : vector<16x16xf32>
    %97 = math.exp %96 : vector<16x16xf32>
    %cst_36 = arith.constant dense<0.000000e+00> : vector<16xf32>
    %98 = vector.multi_reduction <add>, %97, %cst_36 [1] : vector<16x16xf32> to vector<16xf32>
    %99 = vector.shape_cast %98 : vector<16xf32> to vector<16x1xf32>
    %100 = tpu.reciprocal %99 {approx = true} : vector<16x1xf32> -> vector<16x1xf32>
    %101 = vector.broadcast %100 : vector<16x1xf32> to vector<16x16xf32>
    %102 = arith.mulf %97, %101 : vector<16x16xf32>
    %103 = vector.extract_strided_slice %10 {offsets = [0, 16], sizes = [16, 8], strides = [1, 1]} : vector<16x32xbf16> to vector<16x8xbf16>
    %104 = arith.truncf %102 : vector<16x16xf32> to vector<16x16xbf16>
    %cst_37 = arith.constant dense<0.000000e+00> : vector<16x8xf32>
    %105 = tpu.matmul %104, %103, %cst_37 {dimension_numbers = #tpu.dot_dimension_numbers<[1], [0], [0], [1], [0, 0, 1, 1], [], []>} : vector<16x16xbf16>, vector<16x8xbf16>, vector<16x8xf32> -> vector<16x8xf32>
    %cst_38 = arith.constant 0.000000e+00 : f32
    %106 = vector.broadcast %cst_38 : f32 to vector<16x8xf32>
    %107 = arith.cmpf ogt, %105, %106 : vector<16x8xf32>
    %cst_39 = arith.constant 0.000000e+00 : f32
    %108 = vector.broadcast %cst_39 : f32 to vector<16x8xf32>
    %109 = arith.minimumf %105, %108 : vector<16x8xf32>
    %110 = math.exp %109 : vector<16x8xf32>
    %cst_40 = arith.constant 1.000000e+00 : f32
    %111 = vector.broadcast %cst_40 : f32 to vector<16x8xf32>
    %112 = arith.subf %110, %111 : vector<16x8xf32>
    %113 = arith.select %107, %105, %112 : vector<16x8xi1>, vector<16x8xf32>
    %114 = vector.extract_strided_slice %12 {offsets = [0, 3], sizes = [16, 1], strides = [1, 1]} : vector<16x4xf32> to vector<16x1xf32>
    %115 = vector.extract_strided_slice %14 {offsets = [3, 0], sizes = [1, 16], strides = [1, 1]} : vector<4x16xf32> to vector<1x16xf32>
    %116 = vector.broadcast %114 : vector<16x1xf32> to vector<16x16xf32>
    %117 = vector.broadcast %115 : vector<1x16xf32> to vector<16x16xf32>
    %118 = arith.addf %116, %117 : vector<16x16xf32>
    %cst_41 = arith.constant 0.000000e+00 : f32
    %119 = vector.broadcast %cst_41 : f32 to vector<16x16xf32>
    %120 = arith.cmpf ogt, %118, %119 : vector<16x16xf32>
    %cst_42 = arith.constant 2.000000e-01 : f32
    %121 = vector.broadcast %cst_42 : f32 to vector<16x16xf32>
    %122 = arith.mulf %121, %118 : vector<16x16xf32>
    %123 = arith.select %120, %118, %122 : vector<16x16xi1>, vector<16x16xf32>
    %cst_43 = arith.constant -9.000000e+15 : f32
    %124 = vector.broadcast %cst_43 : f32 to vector<16x16xf32>
    %125 = arith.select %6, %123, %124 : vector<16x16xi1>, vector<16x16xf32>
    %cst_44 = arith.constant dense<0xFF800000> : vector<16xf32>
    %126 = vector.multi_reduction <maximumf>, %125, %cst_44 [1] : vector<16x16xf32> to vector<16xf32>
    %127 = vector.shape_cast %126 : vector<16xf32> to vector<16x1xf32>
    %128 = vector.broadcast %127 : vector<16x1xf32> to vector<16x16xf32>
    %129 = arith.subf %125, %128 : vector<16x16xf32>
    %130 = math.exp %129 : vector<16x16xf32>
    %cst_45 = arith.constant dense<0.000000e+00> : vector<16xf32>
    %131 = vector.multi_reduction <add>, %130, %cst_45 [1] : vector<16x16xf32> to vector<16xf32>
    %132 = vector.shape_cast %131 : vector<16xf32> to vector<16x1xf32>
    %133 = tpu.reciprocal %132 {approx = true} : vector<16x1xf32> -> vector<16x1xf32>
    %134 = vector.broadcast %133 : vector<16x1xf32> to vector<16x16xf32>
    %135 = arith.mulf %130, %134 : vector<16x16xf32>
    %136 = vector.extract_strided_slice %10 {offsets = [0, 24], sizes = [16, 8], strides = [1, 1]} : vector<16x32xbf16> to vector<16x8xbf16>
    %137 = arith.truncf %135 : vector<16x16xf32> to vector<16x16xbf16>
    %cst_46 = arith.constant dense<0.000000e+00> : vector<16x8xf32>
    %138 = tpu.matmul %137, %136, %cst_46 {dimension_numbers = #tpu.dot_dimension_numbers<[1], [0], [0], [1], [0, 0, 1, 1], [], []>} : vector<16x16xbf16>, vector<16x8xbf16>, vector<16x8xf32> -> vector<16x8xf32>
    %cst_47 = arith.constant 0.000000e+00 : f32
    %139 = vector.broadcast %cst_47 : f32 to vector<16x8xf32>
    %140 = arith.cmpf ogt, %138, %139 : vector<16x8xf32>
    %cst_48 = arith.constant 0.000000e+00 : f32
    %141 = vector.broadcast %cst_48 : f32 to vector<16x8xf32>
    %142 = arith.minimumf %138, %141 : vector<16x8xf32>
    %143 = math.exp %142 : vector<16x8xf32>
    %cst_49 = arith.constant 1.000000e+00 : f32
    %144 = vector.broadcast %cst_49 : f32 to vector<16x8xf32>
    %145 = arith.subf %143, %144 : vector<16x8xf32>
    %146 = arith.select %140, %138, %145 : vector<16x8xi1>, vector<16x8xf32>
    %147 = tpu.concatenate %47, %80, %113, %146 in 1 : vector<16x8xf32>, vector<16x8xf32>, vector<16x8xf32>, vector<16x8xf32> -> vector<16x32xf32>
    %148 = arith.addf %147, %1 : vector<16x32xf32>
    %c0_50 = arith.constant 0 : index
    %c0_51 = arith.constant 0 : index
    %c0_52 = arith.constant 0 : index
    %149 = vector.load %arg6[%c0_50, %c0_51, %c0_52] : memref<1x16x32xf32, #tpu.memory_space<vmem>>, vector<1x16x32xf32>
    %150 = vector.shape_cast %149 : vector<1x16x32xf32> to vector<16x32xf32>
    %151 = vector.shape_cast %148 : vector<16x32xf32> to vector<1x16x32xf32>
    tpu.vector_store %arg6[%c0_50, %c0_51, %c0_52], %151 {strides = array<i32>} : memref<1x16x32xf32, #tpu.memory_space<vmem>>, vector<1x16x32xf32>,
    return
  }
  func.func @transform_0(%arg0: i32) -> (i32, i32, i32) {
    %c0_i32 = arith.constant 0 : i32
    %c0_i32_0 = arith.constant 0 : i32
    %c0_i32_1 = arith.constant 0 : i32
    return %arg0, %c0_i32, %c0_i32_0 : i32, i32, i32
  }
  func.func @transform_1(%arg0: i32) -> (i32, i32, i32) {
    %c0_i32 = arith.constant 0 : i32
    %c0_i32_0 = arith.constant 0 : i32
    %c0_i32_1 = arith.constant 0 : i32
    return %arg0, %c0_i32, %c0_i32_0 : i32, i32, i32
  }
  func.func @transform_2(%arg0: i32) -> (i32, i32) {
    %c0_i32 = arith.constant 0 : i32
    %c0_i32_0 = arith.constant 0 : i32
    %c0_i32_1 = arith.constant 0 : i32
    return %c0_i32, %c0_i32_0 : i32, i32
  }
  func.func @transform_3(%arg0: i32) -> (i32, i32) {
    %c0_i32 = arith.constant 0 : i32
    %c0_i32_0 = arith.constant 0 : i32
    %c0_i32_1 = arith.constant 0 : i32
    return %c0_i32, %c0_i32_0 : i32, i32
  }
  func.func @transform_4(%arg0: i32) -> (i32, i32) {
    %c0_i32 = arith.constant 0 : i32
    %c0_i32_0 = arith.constant 0 : i32
    %c0_i32_1 = arith.constant 0 : i32
    return %c0_i32, %c0_i32_0 : i32, i32
  }
  func.func @transform_5(%arg0: i32) -> (i32, i32, i32) {
    %c0_i32 = arith.constant 0 : i32
    %c0_i32_0 = arith.constant 0 : i32
    %c0_i32_1 = arith.constant 0 : i32
    return %arg0, %c0_i32, %c0_i32_0 : i32, i32, i32
  }
}

module attributes {stable_mosaic.version = 11 : i64} {
  func.func @_gat_layer_kernel(%arg0: i32, %arg1: memref<1x16x32xf32, #tpu.memory_space<vmem>>, %arg2: memref<1x16x16xi8, #tpu.memory_space<vmem>>, %arg3: memref<32x32xbf16, #tpu.memory_space<vmem>>, %arg4: memref<32x4xbf16, #tpu.memory_space<vmem>>, %arg5: memref<4x32xbf16, #tpu.memory_space<vmem>>, %arg6: memref<1x16x32xf32, #tpu.memory_space<vmem>>) attributes {dimension_semantics = [#tpu.dimension_semantics<parallel>], iteration_bounds = array<i64: 2>, scalar_prefetch = 0 : i64, scratch_operands = 0 : i64, tpu.core_type = #tpu.core_type<tc>, window_params = [{transform_indices = @transform_0, window_bounds = array<i64: 1, 16, 32>}, {transform_indices = @transform_1, window_bounds = array<i64: 1, 16, 16>}, {pipeline_mode = #tpu.pipeline_mode<synchronous>, transform_indices = @transform_2, window_bounds = array<i64: 32, 32>}, {pipeline_mode = #tpu.pipeline_mode<synchronous>, transform_indices = @transform_3, window_bounds = array<i64: 32, 4>}, {pipeline_mode = #tpu.pipeline_mode<synchronous>, transform_indices = @transform_4, window_bounds = array<i64: 4, 32>}, {transform_indices = @transform_5, window_bounds = array<i64: 1, 16, 32>}]} {
    %c0 = arith.constant 0 : index
    %c0_0 = arith.constant 0 : index
    %c0_1 = arith.constant 0 : index
    %0 = vector.load %arg1[%c0, %c0_0, %c0_1] : memref<1x16x32xf32, #tpu.memory_space<vmem>>, vector<1x16x32xf32>
    %1 = vector.shape_cast %0 : vector<1x16x32xf32> to vector<16x32xf32>
    %c0_2 = arith.constant 0 : index
    %c0_3 = arith.constant 0 : index
    %c0_4 = arith.constant 0 : index
    %2 = vector.load %arg2[%c0_2, %c0_3, %c0_4] : memref<1x16x16xi8, #tpu.memory_space<vmem>>, vector<1x16x16xi8>
    %3 = vector.shape_cast %2 : vector<1x16x16xi8> to vector<16x16xi8>
    %4 = arith.sitofp %3 : vector<16x16xi8> to vector<16x16xf32>
    %cst = arith.constant 0.000000e+00 : f32
    %5 = vector.broadcast %cst : f32 to vector<16x16xf32>
    %6 = arith.cmpf ogt, %4, %5 : vector<16x16xf32>
    %7 = arith.truncf %1 : vector<16x32xf32> to vector<16x32xbf16>
    %c0_5 = arith.constant 0 : index
    %c0_6 = arith.constant 0 : index
    %8 = vector.load %arg3[%c0_5, %c0_6] : memref<32x32xbf16, #tpu.memory_space<vmem>>, vector<32x32xbf16>
    %cst_7 = arith.constant dense<0.000000e+00> : vector<16x32xf32>
    %9 = tpu.matmul %7, %8, %cst_7 {dimension_numbers = #tpu.dot_dimension_numbers<[1], [0], [0], [1], [0, 0, 1, 1], [], []>} : vector<16x32xbf16>, vector<32x32xbf16>, vector<16x32xf32> -> vector<16x32xf32>
    %10 = arith.truncf %9 : vector<16x32xf32> to vector<16x32xbf16>
    %c0_8 = arith.constant 0 : index
    %c0_9 = arith.constant 0 : index
    %11 = vector.load %arg4[%c0_8, %c0_9] : memref<32x4xbf16, #tpu.memory_space<vmem>>, vector<32x4xbf16>
    %cst_10 = arith.constant dense<0.000000e+00> : vector<16x4xf32>
    %12 = tpu.matmul %10, %11, %cst_10 {dimension_numbers = #tpu.dot_dimension_numbers<[1], [0], [0], [1], [0, 0, 1, 1], [], []>} : vector<16x32xbf16>, vector<32x4xbf16>, vector<16x4xf32> -> vector<16x4xf32>
    %c0_11 = arith.constant 0 : index
    %c0_12 = arith.constant 0 : index
    %13 = vector.load %arg5[%c0_11, %c0_12] : memref<4x32xbf16, #tpu.memory_space<vmem>>, vector<4x32xbf16>
    %cst_13 = arith.constant dense<0.000000e+00> : vector<4x16xf32>
    %14 = tpu.matmul %13, %10, %cst_13 {dimension_numbers = #tpu.dot_dimension_numbers<[1], [1], [0], [0], [0, 0, 1, 0], [], []>} : vector<4x32xbf16>, vector<16x32xbf16>, vector<4x16xf32> -> vector<4x16xf32>
    %15 = vector.extract_strided_slice %12 {offsets = [0, 0], sizes = [16, 1], strides = [1, 1]} : vector<16x4xf32> to vector<16x1xf32>
    %16 = vector.extract_strided_slice %14 {offsets = [0, 0], sizes = [1, 16], strides = [1, 1]} : vector<4x16xf32> to vector<1x16xf32>
    %17 = vector.broadcast %15 : vector<16x1xf32> to vector<16x16xf32>
    %18 = vector.broadcast %16 : vector<1x16xf32> to vector<16x16xf32>
    %19 = arith.addf %17, %18 : vector<16x16xf32>
    %cst_14 = arith.constant 0.000000e+00 : f32
    %20 = vector.broadcast %cst_14 : f32 to vector<16x16xf32>
    %21 = arith.cmpf ogt, %19, %20 : vector<16x16xf32>
    %cst_15 = arith.constant 2.000000e-01 : f32
    %22 = vector.broadcast %cst_15 : f32 to vector<16x16xf32>
    %23 = arith.mulf %22, %19 : vector<16x16xf32>
    %24 = arith.select %21, %19, %23 : vector<16x16xi1>, vector<16x16xf32>
    %cst_16 = arith.constant -9.000000e+15 : f32
    %25 = vector.broadcast %cst_16 : f32 to vector<16x16xf32>
    %26 = arith.select %6, %24, %25 : vector<16x16xi1>, vector<16x16xf32>
    %cst_17 = arith.constant dense<0xFF800000> : vector<16xf32>
    %27 = vector.multi_reduction <maximumf>, %26, %cst_17 [1] : vector<16x16xf32> to vector<16xf32>
    %28 = vector.shape_cast %27 : vector<16xf32> to vector<16x1xf32>
    %29 = vector.broadcast %28 : vector<16x1xf32> to vector<16x16xf32>
    %30 = arith.subf %26, %29 : vector<16x16xf32>
    %31 = math.exp %30 : vector<16x16xf32>
    %cst_18 = arith.constant dense<0.000000e+00> : vector<16xf32>
    %32 = vector.multi_reduction <add>, %31, %cst_18 [1] : vector<16x16xf32> to vector<16xf32>
    %33 = vector.shape_cast %32 : vector<16xf32> to vector<16x1xf32>
    %34 = tpu.reciprocal %33 {approx = true} : vector<16x1xf32> -> vector<16x1xf32>
    %35 = vector.broadcast %34 : vector<16x1xf32> to vector<16x16xf32>
    %36 = arith.mulf %31, %35 : vector<16x16xf32>
    %37 = vector.extract_strided_slice %10 {offsets = [0, 0], sizes = [16, 8], strides = [1, 1]} : vector<16x32xbf16> to vector<16x8xbf16>
    %38 = arith.truncf %36 : vector<16x16xf32> to vector<16x16xbf16>
    %cst_19 = arith.constant dense<0.000000e+00> : vector<16x8xf32>
    %39 = tpu.matmul %38, %37, %cst_19 {dimension_numbers = #tpu.dot_dimension_numbers<[1], [0], [0], [1], [0, 0, 1, 1], [], []>} : vector<16x16xbf16>, vector<16x8xbf16>, vector<16x8xf32> -> vector<16x8xf32>
    %cst_20 = arith.constant 0.000000e+00 : f32
    %40 = vector.broadcast %cst_20 : f32 to vector<16x8xf32>
    %41 = arith.cmpf ogt, %39, %40 : vector<16x8xf32>
    %cst_21 = arith.constant 0.000000e+00 : f32
    %42 = vector.broadcast %cst_21 : f32 to vector<16x8xf32>
    %43 = arith.minimumf %39, %42 : vector<16x8xf32>
    %44 = math.exp %43 : vector<16x8xf32>
    %cst_22 = arith.constant 1.000000e+00 : f32
    %45 = vector.broadcast %cst_22 : f32 to vector<16x8xf32>
    %46 = arith.subf %44, %45 : vector<16x8xf32>
    %47 = arith.select %41, %39, %46 : vector<16x8xi1>, vector<16x8xf32>
    %48 = vector.extract_strided_slice %12 {offsets = [0, 1], sizes = [16, 1], strides = [1, 1]} : vector<16x4xf32> to vector<16x1xf32>
    %49 = vector.extract_strided_slice %14 {offsets = [1, 0], sizes = [1, 16], strides = [1, 1]} : vector<4x16xf32> to vector<1x16xf32>
    %50 = vector.broadcast %48 : vector<16x1xf32> to vector<16x16xf32>
    %51 = vector.broadcast %49 : vector<1x16xf32> to vector<16x16xf32>
    %52 = arith.addf %50, %51 : vector<16x16xf32>
    %cst_23 = arith.constant 0.000000e+00 : f32
    %53 = vector.broadcast %cst_23 : f32 to vector<16x16xf32>
    %54 = arith.cmpf ogt, %52, %53 : vector<16x16xf32>
    %cst_24 = arith.constant 2.000000e-01 : f32
    %55 = vector.broadcast %cst_24 : f32 to vector<16x16xf32>
    %56 = arith.mulf %55, %52 : vector<16x16xf32>
    %57 = arith.select %54, %52, %56 : vector<16x16xi1>, vector<16x16xf32>
    %cst_25 = arith.constant -9.000000e+15 : f32
    %58 = vector.broadcast %cst_25 : f32 to vector<16x16xf32>
    %59 = arith.select %6, %57, %58 : vector<16x16xi1>, vector<16x16xf32>
    %cst_26 = arith.constant dense<0xFF800000> : vector<16xf32>
    %60 = vector.multi_reduction <maximumf>, %59, %cst_26 [1] : vector<16x16xf32> to vector<16xf32>
    %61 = vector.shape_cast %60 : vector<16xf32> to vector<16x1xf32>
    %62 = vector.broadcast %61 : vector<16x1xf32> to vector<16x16xf32>
    %63 = arith.subf %59, %62 : vector<16x16xf32>
    %64 = math.exp %63 : vector<16x16xf32>
    %cst_27 = arith.constant dense<0.000000e+00> : vector<16xf32>
    %65 = vector.multi_reduction <add>, %64, %cst_27 [1] : vector<16x16xf32> to vector<16xf32>
    %66 = vector.shape_cast %65 : vector<16xf32> to vector<16x1xf32>
    %67 = tpu.reciprocal %66 {approx = true} : vector<16x1xf32> -> vector<16x1xf32>
    %68 = vector.broadcast %67 : vector<16x1xf32> to vector<16x16xf32>
    %69 = arith.mulf %64, %68 : vector<16x16xf32>
    %70 = vector.extract_strided_slice %10 {offsets = [0, 8], sizes = [16, 8], strides = [1, 1]} : vector<16x32xbf16> to vector<16x8xbf16>
    %71 = arith.truncf %69 : vector<16x16xf32> to vector<16x16xbf16>
    %cst_28 = arith.constant dense<0.000000e+00> : vector<16x8xf32>
    %72 = tpu.matmul %71, %70, %cst_28 {dimension_numbers = #tpu.dot_dimension_numbers<[1], [0], [0], [1], [0, 0, 1, 1], [], []>} : vector<16x16xbf16>, vector<16x8xbf16>, vector<16x8xf32> -> vector<16x8xf32>
    %cst_29 = arith.constant 0.000000e+00 : f32
    %73 = vector.broadcast %cst_29 : f32 to vector<16x8xf32>
    %74 = arith.cmpf ogt, %72, %73 : vector<16x8xf32>
    %cst_30 = arith.constant 0.000000e+00 : f32
    %75 = vector.broadcast %cst_30 : f32 to vector<16x8xf32>
    %76 = arith.minimumf %72, %75 : vector<16x8xf32>
    %77 = math.exp %76 : vector<16x8xf32>
    %cst_31 = arith.constant 1.000000e+00 : f32
    %78 = vector.broadcast %cst_31 : f32 to vector<16x8xf32>
    %79 = arith.subf %77, %78 : vector<16x8xf32>
    %80 = arith.select %74, %72, %79 : vector<16x8xi1>, vector<16x8xf32>
    %81 = vector.extract_strided_slice %12 {offsets = [0, 2], sizes = [16, 1], strides = [1, 1]} : vector<16x4xf32> to vector<16x1xf32>
    %82 = vector.extract_strided_slice %14 {offsets = [2, 0], sizes = [1, 16], strides = [1, 1]} : vector<4x16xf32> to vector<1x16xf32>
    %83 = vector.broadcast %81 : vector<16x1xf32> to vector<16x16xf32>
    %84 = vector.broadcast %82 : vector<1x16xf32> to vector<16x16xf32>
    %85 = arith.addf %83, %84 : vector<16x16xf32>
    %cst_32 = arith.constant 0.000000e+00 : f32
    %86 = vector.broadcast %cst_32 : f32 to vector<16x16xf32>
    %87 = arith.cmpf ogt, %85, %86 : vector<16x16xf32>
    %cst_33 = arith.constant 2.000000e-01 : f32
    %88 = vector.broadcast %cst_33 : f32 to vector<16x16xf32>
    %89 = arith.mulf %88, %85 : vector<16x16xf32>
    %90 = arith.select %87, %85, %89 : vector<16x16xi1>, vector<16x16xf32>
    %cst_34 = arith.constant -9.000000e+15 : f32
    %91 = vector.broadcast %cst_34 : f32 to vector<16x16xf32>
    %92 = arith.select %6, %90, %91 : vector<16x16xi1>, vector<16x16xf32>
    %cst_35 = arith.constant dense<0xFF800000> : vector<16xf32>
    %93 = vector.multi_reduction <maximumf>, %92, %cst_35 [1] : vector<16x16xf32> to vector<16xf32>
    %94 = vector.shape_cast %93 : vector<16xf32> to vector<16x1xf32>
    %95 = vector.broadcast %94 : vector<16x1xf32> to vector<16x16xf32>
    %96 = arith.subf %92, %95 : vector<16x16xf32>
    %97 = math.exp %96 : vector<16x16xf32>
    %cst_36 = arith.constant dense<0.000000e+00> : vector<16xf32>
    %98 = vector.multi_reduction <add>, %97, %cst_36 [1] : vector<16x16xf32> to vector<16xf32>
    %99 = vector.shape_cast %98 : vector<16xf32> to vector<16x1xf32>
    %100 = tpu.reciprocal %99 {approx = true} : vector<16x1xf32> -> vector<16x1xf32>
    %101 = vector.broadcast %100 : vector<16x1xf32> to vector<16x16xf32>
    %102 = arith.mulf %97, %101 : vector<16x16xf32>
    %103 = vector.extract_strided_slice %10 {offsets = [0, 16], sizes = [16, 8], strides = [1, 1]} : vector<16x32xbf16> to vector<16x8xbf16>
    %104 = arith.truncf %102 : vector<16x16xf32> to vector<16x16xbf16>
    %cst_37 = arith.constant dense<0.000000e+00> : vector<16x8xf32>
    %105 = tpu.matmul %104, %103, %cst_37 {dimension_numbers = #tpu.dot_dimension_numbers<[1], [0], [0], [1], [0, 0, 1, 1], [], []>} : vector<16x16xbf16>, vector<16x8xbf16>, vector<16x8xf32> -> vector<16x8xf32>
    %cst_38 = arith.constant 0.000000e+00 : f32
    %106 = vector.broadcast %cst_38 : f32 to vector<16x8xf32>
    %107 = arith.cmpf ogt, %105, %106 : vector<16x8xf32>
    %cst_39 = arith.constant 0.000000e+00 : f32
    %108 = vector.broadcast %cst_39 : f32 to vector<16x8xf32>
    %109 = arith.minimumf %105, %108 : vector<16x8xf32>
    %110 = math.exp %109 : vector<16x8xf32>
    %cst_40 = arith.constant 1.000000e+00 : f32
    %111 = vector.broadcast %cst_40 : f32 to vector<16x8xf32>
    %112 = arith.subf %110, %111 : vector<16x8xf32>
    %113 = arith.select %107, %105, %112 : vector<16x8xi1>, vector<16x8xf32>
    %114 = vector.extract_strided_slice %12 {offsets = [0, 3], sizes = [16, 1], strides = [1, 1]} : vector<16x4xf32> to vector<16x1xf32>
    %115 = vector.extract_strided_slice %14 {offsets = [3, 0], sizes = [1, 16], strides = [1, 1]} : vector<4x16xf32> to vector<1x16xf32>
    %116 = vector.broadcast %114 : vector<16x1xf32> to vector<16x16xf32>
    %117 = vector.broadcast %115 : vector<1x16xf32> to vector<16x16xf32>
    %118 = arith.addf %116, %117 : vector<16x16xf32>
    %cst_41 = arith.constant 0.000000e+00 : f32
    %119 = vector.broadcast %cst_41 : f32 to vector<16x16xf32>
    %120 = arith.cmpf ogt, %118, %119 : vector<16x16xf32>
    %cst_42 = arith.constant 2.000000e-01 : f32
    %121 = vector.broadcast %cst_42 : f32 to vector<16x16xf32>
    %122 = arith.mulf %121, %118 : vector<16x16xf32>
    %123 = arith.select %120, %118, %122 : vector<16x16xi1>, vector<16x16xf32>
    %cst_43 = arith.constant -9.000000e+15 : f32
    %124 = vector.broadcast %cst_43 : f32 to vector<16x16xf32>
    %125 = arith.select %6, %123, %124 : vector<16x16xi1>, vector<16x16xf32>
    %cst_44 = arith.constant dense<0xFF800000> : vector<16xf32>
    %126 = vector.multi_reduction <maximumf>, %125, %cst_44 [1] : vector<16x16xf32> to vector<16xf32>
    %127 = vector.shape_cast %126 : vector<16xf32> to vector<16x1xf32>
    %128 = vector.broadcast %127 : vector<16x1xf32> to vector<16x16xf32>
    %129 = arith.subf %125, %128 : vector<16x16xf32>
    %130 = math.exp %129 : vector<16x16xf32>
    %cst_45 = arith.constant dense<0.000000e+00> : vector<16xf32>
    %131 = vector.multi_reduction <add>, %130, %cst_45 [1] : vector<16x16xf32> to vector<16xf32>
    %132 = vector.shape_cast %131 : vector<16xf32> to vector<16x1xf32>
    %133 = tpu.reciprocal %132 {approx = true} : vector<16x1xf32> -> vector<16x1xf32>
    %134 = vector.broadcast %133 : vector<16x1xf32> to vector<16x16xf32>
    %135 = arith.mulf %130, %134 : vector<16x16xf32>
    %136 = vector.extract_strided_slice %10 {offsets = [0, 24], sizes = [16, 8], strides = [1, 1]} : vector<16x32xbf16> to vector<16x8xbf16>
    %137 = arith.truncf %135 : vector<16x16xf32> to vector<16x16xbf16>
    %cst_46 = arith.constant dense<0.000000e+00> : vector<16x8xf32>
    %138 = tpu.matmul %137, %136, %cst_46 {dimension_numbers = #tpu.dot_dimension_numbers<[1], [0], [0], [1], [0, 0, 1, 1], [], []>} : vector<16x16xbf16>, vector<16x8xbf16>, vector<16x8xf32> -> vector<16x8xf32>
    %cst_47 = arith.constant 0.000000e+00 : f32
    %139 = vector.broadcast %cst_47 : f32 to vector<16x8xf32>
    %140 = arith.cmpf ogt, %138, %139 : vector<16x8xf32>
    %cst_48 = arith.constant 0.000000e+00 : f32
    %141 = vector.broadcast %cst_48 : f32 to vector<16x8xf32>
    %142 = arith.minimumf %138, %141 : vector<16x8xf32>
    %143 = math.exp %142 : vector<16x8xf32>
    %cst_49 = arith.constant 1.000000e+00 : f32
    %144 = vector.broadcast %cst_49 : f32 to vector<16x8xf32>
    %145 = arith.subf %143, %144 : vector<16x8xf32>
    %146 = arith.select %140, %138, %145 : vector<16x8xi1>, vector<16x8xf32>
    %147 = tpu.concatenate %47, %80, %113, %146 in 1 : vector<16x8xf32>, vector<16x8xf32>, vector<16x8xf32>, vector<16x8xf32> -> vector<16x32xf32>
    %148 = arith.addf %147, %1 : vector<16x32xf32>
    %c0_50 = arith.constant 0 : index
    %c0_51 = arith.constant 0 : index
    %c0_52 = arith.constant 0 : index
    %149 = vector.load %arg6[%c0_50, %c0_51, %c0_52] : memref<1x16x32xf32, #tpu.memory_space<vmem>>, vector<1x16x32xf32>
    %150 = vector.shape_cast %149 : vector<1x16x32xf32> to vector<16x32xf32>
    %151 = vector.shape_cast %148 : vector<16x32xf32> to vector<1x16x32xf32>
    tpu.vector_store %arg6[%c0_50, %c0_51, %c0_52], %151 {strides = array<i32>} : memref<1x16x32xf32, #tpu.memory_space<vmem>>, vector<1x16x32xf32>,
    return
  }
  func.func @transform_0(%arg0: i32) -> (i32, i32, i32) {
    %c0_i32 = arith.constant 0 : i32
    %c0_i32_0 = arith.constant 0 : i32
    %c0_i32_1 = arith.constant 0 : i32
    return %arg0, %c0_i32, %c0_i32_0 : i32, i32, i32
  }
  func.func @transform_1(%arg0: i32) -> (i32, i32, i32) {
    %c0_i32 = arith.constant 0 : i32
    %c0_i32_0 = arith.constant 0 : i32
    %c0_i32_1 = arith.constant 0 : i32
    return %arg0, %c0_i32, %c0_i32_0 : i32, i32, i32
  }
  func.func @transform_2(%arg0: i32) -> (i32, i32) {
    %c0_i32 = arith.constant 0 : i32
    %c0_i32_0 = arith.constant 0 : i32
    %c0_i32_1 = arith.constant 0 : i32
    return %c0_i32, %c0_i32_0 : i32, i32
  }
  func.func @transform_3(%arg0: i32) -> (i32, i32) {
    %c0_i32 = arith.constant 0 : i32
    %c0_i32_0 = arith.constant 0 : i32
    %c0_i32_1 = arith.constant 0 : i32
    return %c0_i32, %c0_i32_0 : i32, i32
  }
  func.func @transform_4(%arg0: i32) -> (i32, i32) {
    %c0_i32 = arith.constant 0 : i32
    %c0_i32_0 = arith.constant 0 : i32
    %c0_i32_1 = arith.constant 0 : i32
    return %c0_i32, %c0_i32_0 : i32, i32
  }
  func.func @transform_5(%arg0: i32) -> (i32, i32, i32) {
    %c0_i32 = arith.constant 0 : i32
    %c0_i32_0 = arith.constant 0 : i32
    %c0_i32_1 = arith.constant 0 : i32
    return %arg0, %c0_i32, %c0_i32_0 : i32, i32, i32
  }
}

</mosaic_0001>

<bundles_post_ra>
// kernel: multilayer_gat.2
= control target key start
LH: loop header
LB: loop body
LE: loop exit
PB: predicated region body
PF: predicated region fallthrough
CT: control target
= control target key end

     0   :  { %s1172_s18 = smov 0   ;;  %s1320_s0 = inlined_call_operand.vmem [shape: f32[2,16,32], index: 0, kind: input, shape index: {}]   ;;  %s1321_s1 = inlined_call_operand.vmem [shape: s8[2,16,16], index: 1, kind: input, shape index: {}]   ;;  %s1322_s2 = inlined_call_operand.vmem [shape: bf16[32,32], index: 2, kind: input, shape index: {}]   ;;  %s1323_s3 = inlined_call_operand.vmem [shape: bf16[32,4], index: 3, kind: input, shape index: {}]   ;;  %s1324_s4 = inlined_call_operand.vmem [shape: bf16[4,32], index: 4, kind: input, shape index: {}]   ;;  %s1325_s5 = inlined_call_operand.vmem [shape: f32[2,16,32], index: 5, kind: output, shape index: {}]  }
   0x1 LB: > { %s943_s19 = sadd.s32 4294967295, %s1128_s18   ;;  %p947_p0 = scmp.ge.s32.totalorder %s1128_s18, 1  ;;  %s1128_s18 = sphi %s1172_s18, %s15_s18  }
   0x2   : > { %p197_p1 = scmp.lt.s32.totalorder %s1128_s18, 3 }
   0x4   : > { %p198_p2 = pnand %p947_p0, %p197_p1 }
   0x5   : > { %v1070_v0 = vld [vmem:[%s1322_s2] sm:$0xff] (!%p198_p2)   ;;  %v1130_v1 = vmov (!%p198_p2), 0.0   ;;  %v1071_v2 = vld [vmem:[%s1322_s2 + $0x8] sm:$0xff] (!%p198_p2)   ;;  %vm1131_vm0 = vmmov (!%p198_p2), 0   ;;  %p230_p3 = scmp.lt.s32.totalorder (!%p198_p2), %s943_s19, 1  ;;  %vm273_vm1 = vcmask (!%p198_p2), 261120   ;;  %v433_v27 = vlaneseq (!%p198_p2) }
   0x6   : > { %201 = sbr.rel (%p198_p2) target bundleno = 1264 (0x4f0), region = 40  ;;  %998 = vmatprep.subr.bf16.mxu0 (!%p198_p2), %v1130_v1  ;;  %1006 = vmatprep.subr.bf16.mxu1 (!%p198_p2), %v1130_v1  ;;  %v1072_v3 = vld [vmem:[%s1323_s3] sm:$0xff] (!%p198_p2)   ;;  %v1073_v7 = vld [vmem:[%s1323_s3 + $0x8] sm:$0xff] (!%p198_p2)   ;;  %v1132_v8 = vmov (!%p198_p2), 1   ;;  %v1133_v9 = vmov (!%p198_p2), 0   ;;  %v1134_v22 = vmov (!%p198_p2), 2  }
   0x7   : > { %999 = vmatpush3.bf16.msra.mxu0 (!%p198_p2), %v1070_v0  ;;  %1002 = vmatprep.mubr.msk.bf16.mxu0 (!%p198_p2), %vm1131_vm0, %v1130_v1  ;;  %v379_v16 = vld [vmem:[%s1324_s4] sm:$0x3] (!%p198_p2)  ;;  %v1135_v26 = vmov (!%p198_p2), 3   ;;  %v434_v28 = vshrl.u32 (!%p198_p2), %v433_v27, 7  ;;  %vm447_vm5 = vcmask (!%p198_p2), 130048   ;;  %s1136_s13 = smov (!%p198_p2), 120  }
   0x8   : > { %1000 = vmatprep.subr.bf16.mxu0 (!%p198_p2), %v1130_v1  ;;  %1010 = vmatprep.mubr.msk.bf16.mxu1 (!%p198_p2), %vm1131_vm0, %v1130_v1  ;;  %s1137_s14 = smov (!%p198_p2), 104   ;;  %s1138_s15 = smov (!%p198_p2), 112  }
   0x9   : > { %1007 = vmatpush3.bf16.msra.mxu1 (!%p198_p2), %v1072_v3  ;;  %1065 = vset.pattern.permute.xlu1 (!%p198_p2), %v1132_v8  ;;  %v537_v30 = vsub.s32 (!%p198_p2), 1, %v434_v28  ;;  %v435_v31 = vsub.s32 (!%p198_p2), 0, %v434_v28  ;;  %v642_v46 = vsub.s32 (!%p198_p2), 2, %v434_v28  ;;  %v746_v60 = vsub.s32 (!%p198_p2), 3, %v434_v28  ;;  %s1139_s16 = smov (!%p198_p2), 8   ;;  %s1140_s17 = smov (!%p198_p2), 16  }
   0xa   : > { %1008 = vmatprep.subr.bf16.mxu1 (!%p198_p2), %v1130_v1  ;;  %1064 = vset.pattern.permute.xlu0 (!%p198_p2), %v1133_v9  ;;  %s1141_s20 = smov (!%p198_p2), 24  }
   0xb   : > { %1001 = vmatpush3.bf16.msra.mxu0 (!%p198_p2), %v1071_v2 }
   0xc   : > { %1014 = vmatprep.subr.bf16.mxu0 (!%p198_p2), %v1130_v1 }
   0xd   : > { %s1327_s19 = smov (!%p230_p3, %s943_s19), 1  ;;  %1009 = vmatpush3.bf16.msra.mxu1 %v1073_v7 }
   0xe   : > { %s975_s26 = sshll.u32 %s1327_s19, 4  ;;  %1020 = vmatprep.subr.bf16.mxu1 %v1130_v1  ;;  %s976_s9 = sshll.u32 %s1327_s19, 2 }
   0xf   : > { %s234_s29 = scalar_lea.vmem %s1320_s0, %s975_s26  ;;  %s239_s12 = scalar_lea.vmem %s1321_s1, %s976_s9 }
  0x10   : > { %v1206_v4 = vld [vmem:[%s234_s29] sm:$0xff]  ;;  %v1208_v5 = vld [vmem:[%s234_s29 + $0x8] sm:$0xff]  ;;  %s244_s23 = scalar_lea.vmem %s1325_s5, %s975_s26 }
  0x11   : > { %v256_v6 = vpack.c.bf16 %v1208_v5, %v1206_v4  ;;  %v979_v29 = vld [vmem:[%s239_s12] sm:$0xf]  }
  0x12   : > { %v980_v32 = vunpack.c.0.s8 %v979_v29  ;;  %v981_v36 = vunpack.c.1.s8 %v979_v29 }
  0x13   : > { %1003 = vmatmul.mubr.msk.bf16.vlgmr.msra.gmra.mrb[0].mxu0 %vm273_vm1, %v256_v6 }
  0x14   : > { %1016 = vmatprep.mubr.msk.bf16.mxu0 %vm1131_vm0, %v1130_v1  ;;  %v1244_v35 = vcvt.s32.f32 %v980_v32  ;;  %v1247_v41 = vcvt.s32.f32 %v981_v36 }
  0x16   : > { %vm254_vm2 = vcmp.gt.f32.partialorder %v1244_v35, 0.0  ;;  %vm255_vm6 = vcmp.gt.f32.partialorder %v1247_v41, 0.0 }
  0xe6   : > { %v311_v10 = vpop.f32.mrb[0].mxu0 }
  0xe7   : > { %v1004_v11 = vpop.f32.mrb[1].mxu0 }
  0xe8   : > { %v314_v12 = vpop.f32.mrb[2].mxu0 }
  0xe9   : > { %v1219_v13 = vpack.c.bf16 %v314_v12, %v311_v10  ;;  %v1005_v14 = vpop.f32.mrb[3].mxu0 }
  0xeb   : > { %1011 = vmatmul.mubr.msk.bf16.vlgmr.msra.gmra.mrb[0].mxu1 %vm273_vm1, %v1219_v13  ;;  %v336_v15 = vsel %vm273_vm1, %v1219_v13, 0 }
  0xec   : > { %1021 = vmatpush3.bf16.msra.mxu1 %v1219_v13  ;;  %1015 = vmatpush3.bf16.xpose.msra.mxu0 %v336_v15 }
  0xed   : > { %1026 = vmatprep.subr.bf16.mxu0 %v1130_v1  ;;  %1022 = vmatprep.mubr.msk.bf16.mxu1 %vm1131_vm0, %v1130_v1 }
  0xee   : > { %1032 = vmatprep.subr.bf16.mxu1 %v1130_v1 }
  0xf3   : > { %1017 = vmatmul.mubr.msk.bf16.vlgmr.msra.gmra.mrb[4].mxu0 %vm273_vm1, %v379_v16 }
  0xf4   : > { %1028 = vmatprep.mubr.msk.bf16.mxu0 %vm1131_vm0, %v1130_v1 }
 0x1be   : > { %v372_v17 = vpop.f32.mrb[0].mxu1 }
 0x1bf   : > { %528 = vperm.xlu1 %1065, %v372_v17   ;;  %425 = vperm.xlu0 %1064, %v372_v17   ;;  %v1012_v18 = vpop.f32.mrb[1].mxu1 }
 0x1c0   : > { %v375_v19 = vpop.f32.mrb[2].mxu1 }
 0x1c1   : > { %v1013_v20 = vpop.f32.mrb[3].mxu1 }
 0x1c3   : > { %532 = vperm.xlu1 %1065, %v375_v19   ;;  %430 = vperm.xlu0 %1064, %v375_v19  }
 0x1c6   : > { %v1236_v21 = vpop.f32.mrb[4].mxu0 }
 0x1c7   : > { %1067 = vset.pattern.permute.xlu1 %v1134_v22  ;;  %1066 = vset.pattern.permute.xlu0 %v1134_v22  ;;  %v1018_v23 = vpop.f32.mrb[5].mxu0  ;;  %v538_v33 = vrot.slane %v1236_v21, %v537_v30  ;;  %v436_v34 = vrot.slane %v1236_v21, %v435_v31  ;;  %v643_v55 = vrot.slane %v1236_v21, %v642_v46 }
 0x1c8   : > { %637 = vperm.xlu1 %1067, %v375_v19   ;;  %633 = vperm.xlu0 %1066, %v372_v17   ;;  %v420_v24 = vpop.f32.mrb[6].mxu0  ;;  %v747_v9 = vrot.slane %v1236_v21, %v746_v60 }
 0x1c9   : > { %v1019_v25 = vpop.f32.mrb[7].mxu0 }
 0x1cc   : > { %1068 = vset.pattern.permute.xlu1 %v1135_v26  ;;  %1069 = vset.pattern.permute.xlu0 %v1135_v26 }
 0x1cd   : > { %737 = vperm.xlu1 %1068, %v372_v17   ;;  %741 = vperm.xlu0 %1069, %v375_v19  }
 0x23e   : > { %v529_v37 = vpop.permute.xlu1 %528  ;;  %v426_v38 = vpop.permute.xlu0 %425 }
 0x23f   : > { %v539_v39 = vadd.f32 %v538_v33, %v529_v37  ;;  %v437_v40 = vadd.f32 %v436_v34, %v426_v38 }
 0x241   : > { %v543_v42 = vmul.f32 0.2, %v539_v39  ;;  %v441_v43 = vmul.f32 0.2, %v437_v40  ;;  %vm439_vm3 = vcmp.gt.f32.partialorder %v437_v40, 0.0  ;;  %vm541_vm4 = vcmp.gt.f32.partialorder %v539_v39, 0.0 }
 0x242   : > { %v533_v44 = vpop.permute.xlu1 %532  ;;  %v431_v45 = vpop.permute.xlu0 %430 }
 0x243   : > { %v540_v47 = vadd.f32 %v538_v33, %v533_v44  ;;  %v438_v48 = vadd.f32 %v436_v34, %v431_v45  ;;  %v443_v49 = vsel %vm439_vm3, %v437_v40, %v441_v43  ;;  %v545_v50 = vsel %vm541_vm4, %v539_v39, %v543_v42 }
 0x244   : > { %v445_v51 = vsel %vm254_vm2, %v443_v49, -9e+15  ;;  %v547_v56 = vsel %vm254_vm2, %v545_v50, -9e+15  ;;  %vm864_vm4 = vcmask 64512  }
 0x245   : > { %v544_v52 = vmul.f32 0.2, %v540_v47  ;;  %v442_v53 = vmul.f32 0.2, %v438_v48  ;;  %v448_v54 = vsel %vm447_vm5, %v445_v51, -inf  ;;  %vm440_vm7 = vcmp.gt.f32.partialorder %v438_v48, 0.0 }
 0x246   : > { %449 = vmax.xlane.f32.xlu1 %v448_v54  ;;  %vm542_vm8 = vcmp.gt.f32.partialorder %v540_v47, 0.0  ;;  %v549_v3 = vsel %vm447_vm5, %v547_v56, -inf }
 0x247   : > { %v638_v57 = vpop.permute.xlu1 %637  ;;  %v634_v58 = vpop.permute.xlu0 %633  ;;  %v444_v59 = vsel %vm440_vm7, %v438_v48, %v442_v53  ;;  %v546_v61 = vsel %vm542_vm8, %v540_v47, %v544_v52  ;;  %vm869_vm7 = vcmask 195584  }
 0x248   : > { %v645_v62 = vadd.f32 %v643_v55, %v638_v57  ;;  %v644_v63 = vadd.f32 %v643_v55, %v634_v58  ;;  %v446_v0 = vsel %vm255_vm6, %v444_v59, -9e+15  ;;  %v548_v6 = vsel %vm255_vm6, %v546_v61, -9e+15 }
 0x249   : > { %v451_v2 = vsel %vm447_vm5, %v446_v0, -inf  ;;  %v552_v17 = vsel %vm447_vm5, %v548_v6, -inf }
 0x24a   : > { %v649_v7 = vmul.f32 0.2, %v645_v62  ;;  %v648_v8 = vmul.f32 0.2, %v644_v63  ;;  %452 = vmax.xlane.f32.xlu0 %v451_v2  ;;  %550 = vmax.xlane.f32.xlu1 %v549_v3  ;;  %vm646_vm9 = vcmp.gt.f32.partialorder %v644_v63, 0.0  ;;  %vm647_vm10 = vcmp.gt.f32.partialorder %v645_v62, 0.0 }
 0x24c   : > { %v738_v10 = vpop.permute.xlu1 %737  ;;  %v742_v11 = vpop.permute.xlu0 %741  ;;  %v650_v12 = vsel %vm646_vm9, %v644_v63, %v648_v8  ;;  %v651_v14 = vsel %vm647_vm10, %v645_v62, %v649_v7 }
 0x24d   : > { %v748_v15 = vadd.f32 %v747_v9, %v738_v10  ;;  %v749_v16 = vadd.f32 %v747_v9, %v742_v11  ;;  %v652_v18 = vsel %vm254_vm2, %v650_v12, -9e+15  ;;  %v653_v20 = vsel %vm255_vm6, %v651_v14, -9e+15 }
 0x24e   : > { %553 = vmax.xlane.f32.xlu0 %v552_v17  ;;  %v654_v19 = vsel %vm447_vm5, %v652_v18, -inf  ;;  %v657_v21 = vsel %vm447_vm5, %v653_v20, -inf }
 0x24f   : > { %v752_v22 = vmul.f32 0.2, %v748_v15  ;;  %v753_v23 = vmul.f32 0.2, %v749_v16  ;;  %655 = vmax.xlane.f32.xlu1 %v654_v19  ;;  %vm750_vm11 = vcmp.gt.f32.partialorder %v748_v15, 0.0  ;;  %vm751_vm12 = vcmp.gt.f32.partialorder %v749_v16, 0.0 }
 0x251   : > { %v754_v24 = vsel %vm750_vm11, %v748_v15, %v752_v22  ;;  %v755_v25 = vsel %vm751_vm12, %v749_v16, %v753_v23 }
 0x252   : > { %658 = vmax.xlane.f32.xlu0 %v657_v21  ;;  %v756_v26 = vsel %vm254_vm2, %v754_v24, -9e+15  ;;  %v757_v27 = vsel %vm255_vm6, %v755_v25, -9e+15 }
 0x253   : > { %v758_v28 = vsel %vm447_vm5, %v756_v26, -inf  ;;  %v761_v29 = vsel %vm447_vm5, %v757_v27, -inf }
 0x254   : > { %759 = vmax.xlane.f32.xlu1 %v758_v28 }
 0x256   : > { %762 = vmax.xlane.f32.xlu0 %v761_v29 }
 0x265   : > { %573 = vrot.lane.b32.xlu1 %v1219_v13, %s1136_s13 }
 0x2d3   : > { %v450_v30 = vpop.xlane.xlu1 %449 }
 0x2d4   : > { %v454_v31 = vsub.f32 %v445_v51, %v450_v30 }
 0x2d6   : > { %v456_v32 = vmul.f32 1.442695, %v454_v31 }
 0x2d7   : > { %v453_v33 = vpop.xlane.xlu0 %452  ;;  %v551_v34 = vpop.xlane.xlu1 %550 }
 0x2d8   : > { %1074 = vpow2.f32 %v456_v32  ;;  %v455_v35 = vsub.f32 %v446_v0, %v453_v33  ;;  %v555_v36 = vsub.f32 %v547_v56, %v551_v34 }
 0x2da   : > { %v458_v37 = vmul.f32 1.442695, %v455_v35  ;;  %v557_v38 = vmul.f32 1.442695, %v555_v36 }
 0x2db   : > { %v554_v39 = vpop.xlane.xlu0 %553 }
 0x2dc   : > { %1076 = vpow2.f32 %v458_v37  ;;  %v556_v40 = vsub.f32 %v548_v6, %v554_v39  ;;  %v656_v41 = vpop.xlane.xlu1 %655 }
 0x2dd   : > { %1078 = vpow2.f32 %v557_v38  ;;  %v660_v42 = vsub.f32 %v652_v18, %v656_v41 }
 0x2de   : > { %v559_v43 = vmul.f32 1.442695, %v556_v40 }
 0x2df   : > { %v662_v44 = vmul.f32 1.442695, %v660_v42  ;;  %v659_v45 = vpop.xlane.xlu0 %658 }
 0x2e0   : > { %1080 = vpow2.f32 %v559_v43  ;;  %v661_v46 = vsub.f32 %v653_v20, %v659_v45 }
 0x2e1   : > { %1082 = vpow2.f32 %v662_v44  ;;  %v760_v47 = vpop.xlane.xlu1 %759 }
 0x2e2   : > { %v1075_v48 = vpop.eup %1074  ;;  %v664_v49 = vmul.f32 1.442695, %v661_v46  ;;  %v764_v50 = vsub.f32 %v756_v26, %v760_v47 }
 0x2e3   : > { %v763_v51 = vpop.xlane.xlu0 %762  ;;  %v460_v52 = vsel %vm447_vm5, %v1075_v48, 0.0 }
 0x2e4   : > { %1084 = vpow2.f32 %v664_v49  ;;  %v766_v53 = vmul.f32 1.442695, %v764_v50  ;;  %v765_v54 = vsub.f32 %v757_v27, %v763_v51  ;;  %461 = vadd.xlane.f32.xlu1 %v460_v52 }
 0x2e5   : > { %v574_v55 = vpop.permute.xlu1 %573 }
 0x2e6   : > { %v1077_v56 = vpop.eup %1076  ;;  %1086 = vpow2.f32 %v766_v53  ;;  %v768_v57 = vmul.f32 1.442695, %v765_v54  ;;  %1027 = vmatpush3.bf16.msra.mxu0 %v574_v55 }
 0x2e7   : > { %v1079_v58 = vpop.eup %1078  ;;  %v463_v59 = vsel %vm447_vm5, %v1077_v56, 0.0  ;;  %1038 = vmatprep.subr.bf16.mxu0 %v1130_v1 }
 0x2e8   : > { %1088 = vpow2.f32 %v768_v57  ;;  %464 = vadd.xlane.f32.xlu0 %v463_v59  ;;  %v561_v60 = vsel %vm447_vm5, %v1079_v58, 0.0 }
 0x2e9   : > { %562 = vadd.xlane.f32.xlu1 %v561_v60 }
 0x2ea   : > { %v1081_v61 = vpop.eup %1080 }
 0x2eb   : > { %v1083_v62 = vpop.eup %1082  ;;  %v564_v63 = vsel %vm447_vm5, %v1081_v61, 0.0 }
 0x2ec   : > { %565 = vadd.xlane.f32.xlu0 %v564_v63  ;;  %v666_v0 = vsel %vm447_vm5, %v1083_v62, 0.0 }
 0x2ed   : > { %667 = vadd.xlane.f32.xlu1 %v666_v0 }
 0x2ee   : > { %v1085_v2 = vpop.eup %1084 }
 0x2ef   : > { %v669_v3 = vsel %vm447_vm5, %v1085_v2, 0.0 }
 0x2f0   : > { %v1087_v6 = vpop.eup %1086  ;;  %670 = vadd.xlane.f32.xlu0 %v669_v3 }
 0x2f1   : > { %v770_v7 = vsel %vm447_vm5, %v1087_v6, 0.0 }
 0x2f2   : > { %v1089_v8 = vpop.eup %1088  ;;  %771 = vadd.xlane.f32.xlu1 %v770_v7 }
 0x2f3   : > { %v773_v9 = vsel %vm447_vm5, %v1089_v8, 0.0 }
 0x2f4   : > { %774 = vadd.xlane.f32.xlu0 %v773_v9 }
 0x303   : > { %781 = vrot.lane.b32.xlu1 %v1219_v13, %s1137_s14 }
 0x30a   : > { %677 = vrot.lane.b32.xlu0 %v1219_v13, %s1138_s15 }
 0x371   : > { %v462_v10 = vpop.xlane.xlu1 %461 }
 0x372   : > { %1090 = vrcp.f32 %v462_v10 }
 0x375   : > { %v465_v11 = vpop.xlane.xlu0 %464 }
 0x376   : > { %1092 = vrcp.f32 %v465_v11  ;;  %v563_v12 = vpop.xlane.xlu1 %562 }
 0x377   : > { %1094 = vrcp.f32 %v563_v12 }
 0x379   : > { %v566_v14 = vpop.xlane.xlu0 %565 }
 0x37a   : > { %1096 = vrcp.f32 %v566_v14  ;;  %v668_v15 = vpop.xlane.xlu1 %667 }
 0x37b   : > { %1098 = vrcp.f32 %v668_v15 }
 0x37c   : > { %v1091_v17 = vpop.eup %1090 }
 0x37d   : > { %v671_v16 = vpop.xlane.xlu0 %670  ;;  %v468_v20 = vmul.f32 %v1091_v17, %v1075_v48 }
 0x37e   : > { %1100 = vrcp.f32 %v671_v16 }
 0x37f   : > { %v772_v18 = vpop.xlane.xlu1 %771 }
 0x380   : > { %v1093_v19 = vpop.eup %1092  ;;  %1102 = vrcp.f32 %v772_v18 }
 0x381   : > { %v469_v22 = vmul.f32 %v1093_v19, %v1077_v56  ;;  %v775_v23 = vpop.xlane.xlu0 %774  ;;  %v1095_v13 = vpop.eup %1094 }
 0x382   : > { %1104 = vrcp.f32 %v775_v23  ;;  %v569_v25 = vmul.f32 %v1095_v13, %v1079_v58 }
 0x383   : > { %v470_v21 = vpack.c.bf16 %v469_v22, %v468_v20  ;;  %v782_v33 = vpop.permute.xlu1 %781 }
 0x384   : > { %v1097_v24 = vpop.eup %1096 }
 0x385   : > { %v570_v26 = vmul.f32 %v1097_v24, %v1081_v61  ;;  %v678_v27 = vpop.permute.xlu0 %677  ;;  %1023 = vmatmul.mubr.msk.bf16.vlgmr.msra.gmra.mrb[4].mxu1 %vm447_vm5, %v470_v21  ;;  %v1099_v28 = vpop.eup %1098 }
 0x386   : > { %1033 = vmatpush3.bf16.msra.mxu1 %v678_v27  ;;  %1034 = vmatprep.mubr.msk.bf16.mxu1 %vm1131_vm0, %v1130_v1  ;;  %v674_v31 = vmul.f32 %v1099_v28, %v1083_v62 }
 0x387   : > { %v571_v29 = vpack.c.bf16 %v570_v26, %v569_v25 }
 0x388   : > { %v1101_v30 = vpop.eup %1100 }
 0x389   : > { %v675_v32 = vmul.f32 %v1101_v30, %v1085_v2  ;;  %1029 = vmatmul.mubr.msk.bf16.vlgmr.msra.gmra.mrb[8].mxu0 %vm447_vm5, %v571_v29 }
 0x38a   : > { %v1103_v34 = vpop.eup %1102  ;;  %1039 = vmatpush3.bf16.msra.mxu0 %v782_v33  ;;  %1040 = vmatprep.mubr.msk.bf16.mxu0 %vm1131_vm0, %v1130_v1 }
 0x38b   : > { %v676_v35 = vpack.c.bf16 %v675_v32, %v674_v31  ;;  %v778_v37 = vmul.f32 %v1103_v34, %v1087_v6 }
 0x38c   : > { %v1105_v36 = vpop.eup %1104 }
 0x38d   : > { %v779_v38 = vmul.f32 %v1105_v36, %v1089_v8  ;;  %1035 = vmatmul.mubr.msk.bf16.vlgmr.msra.gmra.mrb[8].mxu1 %vm447_vm5, %v676_v35 }
 0x38f   : > { %v780_v39 = vpack.c.bf16 %v779_v38, %v778_v37 }
 0x391   : > { %1041 = vmatmul.mubr.msk.bf16.vlgmr.msra.gmra.mrb[12].mxu0 %vm447_vm5, %v780_v39 }
 0x458   : > { %v1296_v40 = vpop.f32.mrb[4].mxu1 }
 0x459   : > { %v1024_v41 = vpop.f32.mrb[5].mxu1  ;;  %v517_v24 = vmin.f32 %v1296_v40, 0.0  ;;  %vm515_vm6 = vcmp.gt.f32.partialorder %v1296_v40, 0.0 }
 0x45a   : > { %v1298_v42 = vpop.f32.mrb[6].mxu1 }
 0x45b   : > { %v1025_v43 = vpop.f32.mrb[7].mxu1  ;;  %v518_v25 = vmin.f32 %v1298_v42, 0.0  ;;  %v519_v26 = vmul.f32 1.442695, %v517_v24  ;;  %vm516_vm8 = vcmp.gt.f32.partialorder %v1298_v42, 0.0 }
 0x45c   : > { %v613_v44 = vpop.f32.mrb[8].mxu0 }
 0x45d   : > { %v622_v45 = vmin.f32 %v613_v44, 0.0  ;;  %v1030_v46 = vpop.f32.mrb[9].mxu0  ;;  %vm620_vm13 = vcmp.gt.f32.partialorder %v613_v44, 0.0  ;;  %v521_v27 = vmul.f32 1.442695, %v518_v25 }
 0x45e   : > { %v616_v47 = vpop.f32.mrb[10].mxu0 }
 0x45f   : > { %v624_v1 = vmul.f32 1.442695, %v622_v45  ;;  %v623_v48 = vmin.f32 %v616_v47, 0.0  ;;  %v1031_v49 = vpop.f32.mrb[11].mxu0  ;;  %vm621_vm14 = vcmp.gt.f32.partialorder %v616_v47, 0.0 }
 0x460   : > { %v717_v50 = vpop.f32.mrb[8].mxu1 }
 0x461   : > { %1106 = vpow2.f32 %v624_v1  ;;  %v626_v51 = vmul.f32 1.442695, %v623_v48  ;;  %v726_v52 = vmin.f32 %v717_v50, 0.0  ;;  %v1036_v53 = vpop.f32.mrb[9].mxu1  ;;  %vm724_vm15 = vcmp.gt.f32.partialorder %v717_v50, 0.0 }
 0x462   : > { %v720_v54 = vpop.f32.mrb[10].mxu1 }
 0x463   : > { %1108 = vpow2.f32 %v626_v51  ;;  %v728_v55 = vmul.f32 1.442695, %v726_v52  ;;  %v727_v56 = vmin.f32 %v720_v54, 0.0  ;;  %v1037_v57 = vpop.f32.mrb[11].mxu1  ;;  %vm725_vm0 = vcmp.gt.f32.partialorder %v720_v54, 0.0 }
 0x464   : > { %v821_v58 = vpop.f32.mrb[12].mxu0 }
 0x465   : > { %1110 = vpow2.f32 %v728_v55  ;;  %v730_v59 = vmul.f32 1.442695, %v727_v56  ;;  %v830_v60 = vmin.f32 %v821_v58, 0.0  ;;  %v1042_v61 = vpop.f32.mrb[13].mxu0  ;;  %vm828_vm2 = vcmp.gt.f32.partialorder %v821_v58, 0.0 }
 0x466   : > { %v824_v62 = vpop.f32.mrb[14].mxu0 }
 0x467   : > { %1112 = vpow2.f32 %v730_v59  ;;  %v832_v63 = vmul.f32 1.442695, %v830_v60  ;;  %v831_v0 = vmin.f32 %v824_v62, 0.0  ;;  %v1043_v2 = vpop.f32.mrb[15].mxu0  ;;  %vm829_vm3 = vcmp.gt.f32.partialorder %v824_v62, 0.0 }
 0x469   : > { %1114 = vpow2.f32 %v832_v63  ;;  %v834_v3 = vmul.f32 1.442695, %v831_v0 }
 0x46b   : > { %v1107_v6 = vpop.eup %1106  ;;  %1116 = vpow2.f32 %v834_v3 }
 0x46c   : > { %v965_v7 = vadd.f32 -1.0, %v1107_v6  ;;  %1118 = vpow2.f32 %v519_v26 }
 0x46d   : > { %v1109_v8 = vpop.eup %1108  ;;  %1120 = vpow2.f32 %v521_v27 }
 0x46e   : > { %v630_v9 = vsel %vm620_vm13, %v613_v44, %v965_v7  ;;  %v966_v10 = vadd.f32 -1.0, %v1109_v8 }
 0x46f   : > { %v1111_v11 = vpop.eup %1110  ;;  %842 = vrot.lane.b32.xlu1 %v630_v9, %s1139_s16 }
 0x470   : > { %v631_v12 = vsel %vm621_vm14, %v616_v47, %v966_v10  ;;  %v968_v14 = vadd.f32 -1.0, %v1111_v11 }
 0x471   : > { %v1113_v15 = vpop.eup %1112  ;;  %844 = vrot.lane.b32.xlu0 %v631_v12, %s1139_s16 }
 0x472   : > { %v734_v16 = vsel %vm724_vm15, %v717_v50, %v968_v14  ;;  %v969_v17 = vadd.f32 -1.0, %v1113_v15 }
 0x473   : > { %v1115_v18 = vpop.eup %1114  ;;  %850 = vrot.lane.b32.xlu1 %v734_v16, %s1140_s17 }
 0x474   : > { %v735_v19 = vsel %vm725_vm0, %v720_v54, %v969_v17  ;;  %v971_v20 = vadd.f32 -1.0, %v1115_v18 }
 0x475   : > { %v1117_v22 = vpop.eup %1116  ;;  %852 = vrot.lane.b32.xlu0 %v735_v19, %s1140_s17 }
 0x476   : > { %v838_v23 = vsel %vm828_vm2, %v821_v58, %v971_v20  ;;  %v972_v13 = vadd.f32 -1.0, %v1117_v22  ;;  %v1119_v28 = vpop.eup %1118 }
 0x477   : > { %858 = vrot.lane.b32.xlu1 %v838_v23, %s1141_s20  ;;  %v1121_v30 = vpop.eup %1120  ;;  %v962_v31 = vadd.f32 -1.0, %v1119_v28 }
 0x478   : > { %v839_v21 = vsel %vm829_vm3, %v824_v62, %v972_v13  ;;  %v963_v33 = vadd.f32 -1.0, %v1121_v30 }
 0x479   : > { %860 = vrot.lane.b32.xlu0 %v839_v21, %s1141_s20  ;;  %v525_v35 = vsel %vm515_vm6, %v1296_v40, %v962_v31 }
 0x47a   : > { %v526_v38 = vsel %vm516_vm8, %v1298_v42, %v963_v33 }
 0x4e1   : > { %v843_v29 = vpop.permute.xlu1 %842 }
 0x4e2   : > { %v865_v37 = vsel %vm864_vm4, %v525_v35, %v843_v29 }
 0x4e3   : > { %v845_v32 = vpop.permute.xlu0 %844 }
 0x4e4   : > { %v866_v43 = vsel %vm864_vm4, %v526_v38, %v845_v32 }
 0x4e5   : > { %v851_v34 = vpop.permute.xlu1 %850 }
 0x4e6   : > { %v867_v39 = vsel %vm447_vm5, %v865_v37, %v851_v34 }
 0x4e7   : > { %v853_v36 = vpop.permute.xlu0 %852 }
 0x4e8   : > { %v868_v45 = vsel %vm447_vm5, %v866_v43, %v853_v36 }
 0x4e9   : > { %v859_v41 = vpop.permute.xlu1 %858 }
 0x4ea   : > { %v870_v44 = vsel %vm869_vm7, %v867_v39, %v859_v41 }
 0x4eb   : > { %v872_v40 = vadd.f32 %v870_v44, %v1206_v4  ;;  %v861_v46 = vpop.permute.xlu0 %860 }
 0x4ec   : > { %v871_v47 = vsel %vm869_vm7, %v868_v45, %v861_v46 }
 0x4ed   : > { %874 = vst.msk [vmem:[%s244_s23] sm:$0xff] %vm273_vm1, %v872_v40  ;;  %v873_v42 = vadd.f32 %v871_v47, %v1208_v5 }
 0x4ef   : > { %875 = vst.msk [vmem:[%s244_s23 + $0x8] sm:$0xff] %vm273_vm1, %v873_v42 }
 0x4f0 PF: > { %s15_s18 = sadd.s32 1, %s1128_s18  }
 0x4f1   : > { %p12_p4 = scmp.ge.s32.totalorder %s15_s18, 4  }
 0x4f3   :  { %14 = sbr.rel (!%p12_p4) target bundleno = 1 (0x1), region = 73 }

// kernel: multilayer_gat.3
= control target key start
LH: loop header
LB: loop body
LE: loop exit
PB: predicated region body
PF: predicated region fallthrough
CT: control target
= control target key end

     0   :  { %10 = vsyncpa [#allocation3], 0  ;;  %s1519_s0 = inlined_call_operand.vmem [shape: f32[2,16,32], index: 0, kind: input, shape index: {}]   ;;  %s1520_s1 = inlined_call_operand.vmem [shape: s8[2,16,16], index: 1, kind: input, shape index: {}]   ;;  %s1521_s2 = inlined_call_operand.vmem [shape: bf16[32,32], index: 2, kind: input, shape index: {}]   ;;  %s1522_s3 = inlined_call_operand.vmem [shape: bf16[32,4], index: 3, kind: input, shape index: {}]   ;;  %s1523_s4 = inlined_call_operand.vmem [shape: bf16[4,32], index: 4, kind: input, shape index: {}]   ;;  %s1524_s5 = inlined_call_operand.hbm [shape: f32[2,16,32], index: 5, kind: output, shape index: {}]  }
   0x1   :  { %12 = vsyncpa [#allocation3 + $0x1], 0  ;;  %s1282_s18 = smov 0   ;;  %s1284_s19 = smov 0  }
   0x2   :  { %s1286_s20 = smov 0   ;;  %s1288_s21 = smov 0  }
   0x3 LB: > { %s1303_s22 = sadd.s32 4294967295, %s1236_s21   ;;  %s962_s23 = sadd.s32 4294967294, %s1236_s21   ;;  %s1236_s21 = sphi %s1288_s21, %s1530_s21   ;;  %s1232_s20 = sphi %s1286_s20, %s1529_s20   ;;  %s1228_s19 = sphi %s1284_s19, %s1528_s19   ;;  %s1224_s18 = sphi %s1282_s18, %s1527_s18  }
   0x4   : > { %s1307_s24 = sadd.s32 1, %s1236_s21   ;;  %s140_s25 = sadd.s32 1, %s1232_s20 }
   0x5   : > { %s137_s26 = ssub.s32 %s1236_s21, %s1307_s24  ;;  %p150_p0 = scmp.ne.s32.totalorder %s1232_s20, %s1228_s19 }
   0x6   : > { %p138_p1 = scmp.eq.s32.totalorder %s137_s26, 0  ;;  %p151_p2 = scmp.eq.s32.totalorder %s1303_s22, 1 }
   0x7   : > { %p156_p3 = scmp.ne.s32.totalorder %s1228_s19, %s1224_s18  ;;  %p157_p4 = scmp.eq.s32.totalorder %s962_s23, 1 }
   0x8   : > { %s1318_s27 = scalar_select %p138_p1, %s1232_s20, %s140_s25  }
   0x9   : > { %p1320_p5 = por %p151_p2, %p150_p0  ;;  %p1324_p6 = por %p157_p4, %p156_p3 }
   0xa   : > { %p965_p7 = scmp.ge.s32.totalorder %s1236_s21, 1  ;;  %p200_p8 = scmp.lt.s32.totalorder %s1236_s21, 3 }
   0xc   : > { %p201_p9 = pnand %p965_p7, %p200_p8 }
   0xd   : > { %v1122_v0 = vld [vmem:[%s1521_s2] sm:$0xff] (!%p201_p9)   ;;  %v1238_v1 = vmov (!%p201_p9), 0.0   ;;  %v1123_v2 = vld [vmem:[%s1521_s2 + $0x8] sm:$0xff] (!%p201_p9)   ;;  %vm1239_vm0 = vmmov (!%p201_p9), 0   ;;  %p233_p10 = scmp.lt.s32.totalorder (!%p201_p9), %s1303_s22, 1  ;;  %vm271_vm1 = vcmask (!%p201_p9), 261120   ;;  %v431_v27 = vlaneseq (!%p201_p9) }
   0xe   : > { %204 = sbr.rel (%p201_p9) target bundleno = 1287 (0x507), region = 40  ;;  %1018 = vmatprep.subr.bf16.mxu0 (!%p201_p9), %v1238_v1  ;;  %1026 = vmatprep.subr.bf16.mxu1 (!%p201_p9), %v1238_v1  ;;  %v1124_v3 = vld [vmem:[%s1522_s3] sm:$0xff] (!%p201_p9)   ;;  %v1125_v7 = vld [vmem:[%s1522_s3 + $0x8] sm:$0xff] (!%p201_p9)   ;;  %v1240_v8 = vmov (!%p201_p9), 1   ;;  %v1241_v9 = vmov (!%p201_p9), 0   ;;  %v1242_v22 = vmov (!%p201_p9), 2  }
   0xf   : > { %1019 = vmatpush3.bf16.msra.mxu0 (!%p201_p9), %v1122_v0  ;;  %1022 = vmatprep.mubr.msk.bf16.mxu0 (!%p201_p9), %vm1239_vm0, %v1238_v1  ;;  %v377_v16 = vld [vmem:[%s1523_s4] sm:$0x3] (!%p201_p9)  ;;  %v1243_v26 = vmov (!%p201_p9), 3   ;;  %v432_v28 = vshrl.u32 (!%p201_p9), %v431_v27, 7  ;;  %vm445_vm5 = vcmask (!%p201_p9), 130048   ;;  %s1244_s8 = smov (!%p201_p9), 120  }
  0x10   : > { %1020 = vmatprep.subr.bf16.mxu0 (!%p201_p9), %v1238_v1  ;;  %1030 = vmatprep.mubr.msk.bf16.mxu1 (!%p201_p9), %vm1239_vm0, %v1238_v1  ;;  %s1245_s9 = smov (!%p201_p9), 104   ;;  %s1246_s10 = smov (!%p201_p9), 112  }
  0x11   : > { %1027 = vmatpush3.bf16.msra.mxu1 (!%p201_p9), %v1124_v3  ;;  %1117 = vset.pattern.permute.xlu1 (!%p201_p9), %v1240_v8  ;;  %v535_v30 = vsub.s32 (!%p201_p9), 1, %v432_v28  ;;  %v433_v31 = vsub.s32 (!%p201_p9), 0, %v432_v28  ;;  %v640_v46 = vsub.s32 (!%p201_p9), 2, %v432_v28  ;;  %v744_v60 = vsub.s32 (!%p201_p9), 3, %v432_v28  ;;  %s1249_s13 = smov (!%p201_p9), 24   ;;  %s230_s14 = sand.u32 (!%p201_p9), 1, %s1228_s19  }
  0x12   : > { %1028 = vmatprep.subr.bf16.mxu1 (!%p201_p9), %v1238_v1  ;;  %1116 = vset.pattern.permute.xlu0 (!%p201_p9), %v1241_v9  ;;  %s997_s16 = sshll.u32 (!%p201_p9), %s1303_s22, 8 }
  0x13   : > { %1021 = vmatpush3.bf16.msra.mxu0 (!%p201_p9), %v1123_v2  ;;  %s1468_s30 = scalar_lea.hbm (!%p201_p9), %s1524_s5, %s997_s16 }
  0x14   : > { %1034 = vmatprep.subr.bf16.mxu0 (!%p201_p9), %v1238_v1 }
  0x15   : > { %s1348_s11 = scalar_select %p233_p10, %s1303_s22, 1  ;;  %1029 = vmatpush3.bf16.msra.mxu1 %v1125_v7 }
  0x16   : > { %1040 = vmatprep.subr.bf16.mxu1 %v1238_v1  ;;  %s1477_s22 = scalar_lea.sflag [#allocation3], %s230_s14 }
  0x17   : > { %s995_s12 = sshll.u32 %s1348_s11, 4  ;;  %s996_s26 = sshll.u32 %s1348_s11, 2 }
  0x18   : > { %s237_s15 = scalar_lea.vmem %s1519_s0, %s995_s12  ;;  %s242_s7 = scalar_lea.vmem %s1520_s1, %s996_s26 }
  0x19   : > { %v1356_v4 = vld [vmem:[%s237_s15] sm:$0xff]  ;;  %v1358_v5 = vld [vmem:[%s237_s15 + $0x8] sm:$0xff]  ;;  %s1247_s11 = smov 8   ;;  %s1248_s12 = smov 16  }
  0x1a   : > { %v254_v6 = vpack.c.bf16 %v1358_v5, %v1356_v4  ;;  %v999_v29 = vld [vmem:[%s242_s7] sm:$0xf]   ;;  %s966_s15 = sshll.u32 %s230_s14, 4  ;;  %s1250_s7 = smov [#allocation2]  }
  0x1b   : > { %v1000_v32 = vunpack.c.0.s8 %v999_v29  ;;  %v1001_v36 = vunpack.c.1.s8 %v999_v29  ;;  %s232_s17 = scalar_lea.vmem [#allocation2], %s966_s15 }
  0x1c   : > { %1023 = vmatmul.mubr.msk.bf16.vlgmr.msra.gmra.mrb[0].mxu0 %vm271_vm1, %v254_v6  ;;  %s888_s23 = sshll.u32 %s232_s17, 4  ;;  %s1472_s23 = int_to_ptr.vmem [resolvable:$true] %s888_s23 }
  0x1d   : > { %1036 = vmatprep.mubr.msk.bf16.mxu0 %vm1239_vm0, %v1238_v1  ;;  %v1394_v35 = vcvt.s32.f32 %v1000_v32  ;;  %v1397_v41 = vcvt.s32.f32 %v1001_v36  ;;  %s1174_s6 = scalar_lea.vmem %s1472_s23, 256 }
  0x1e   : > { %p1175_p11 = scmp.ne.s32.totalorder %s1472_s23, %s1174_s6 }
  0x1f   : > { %vm252_vm2 = vcmp.gt.f32.partialorder %v1394_v35, 0.0  ;;  %vm253_vm6 = vcmp.gt.f32.partialorder %v1397_v41, 0.0 }
  0x20   : > { %p1176_p12 = pnand %p1175_p11, %p1320_p5 }
  0x22   : > { %p1177_p13 = pneg %p1176_p12 }
  0xef   : > { %v309_v10 = vpop.f32.mrb[0].mxu0 }
  0xf0   : > { %v1024_v11 = vpop.f32.mrb[1].mxu0 }
  0xf1   : > { %v312_v12 = vpop.f32.mrb[2].mxu0 }
  0xf2   : > { %v1369_v13 = vpack.c.bf16 %v312_v12, %v309_v10  ;;  %v1025_v14 = vpop.f32.mrb[3].mxu0 }
  0xf4   : > { %1031 = vmatmul.mubr.msk.bf16.vlgmr.msra.gmra.mrb[0].mxu1 %vm271_vm1, %v1369_v13  ;;  %v334_v15 = vsel %vm271_vm1, %v1369_v13, 0 }
  0xf5   : > { %1041 = vmatpush3.bf16.msra.mxu1 %v1369_v13  ;;  %1035 = vmatpush3.bf16.xpose.msra.mxu0 %v334_v15 }
  0xf6   : > { %1046 = vmatprep.subr.bf16.mxu0 %v1238_v1  ;;  %1042 = vmatprep.mubr.msk.bf16.mxu1 %vm1239_vm0, %v1238_v1 }
  0xf7   : > { %1052 = vmatprep.subr.bf16.mxu1 %v1238_v1 }
  0xfc   : > { %1037 = vmatmul.mubr.msk.bf16.vlgmr.msra.gmra.mrb[4].mxu0 %vm271_vm1, %v377_v16 }
  0xfd   : > { %1048 = vmatprep.mubr.msk.bf16.mxu0 %vm1239_vm0, %v1238_v1 }
 0x1c7   : > { %v370_v17 = vpop.f32.mrb[0].mxu1 }
 0x1c8   : > { %526 = vperm.xlu1 %1117, %v370_v17   ;;  %423 = vperm.xlu0 %1116, %v370_v17   ;;  %v1032_v18 = vpop.f32.mrb[1].mxu1 }
 0x1c9   : > { %v373_v19 = vpop.f32.mrb[2].mxu1 }
 0x1ca   : > { %v1033_v20 = vpop.f32.mrb[3].mxu1 }
 0x1cc   : > { %530 = vperm.xlu1 %1117, %v373_v19   ;;  %428 = vperm.xlu0 %1116, %v373_v19  }
 0x1cf   : > { %v1386_v21 = vpop.f32.mrb[4].mxu0 }
 0x1d0   : > { %1119 = vset.pattern.permute.xlu1 %v1242_v22  ;;  %1118 = vset.pattern.permute.xlu0 %v1242_v22  ;;  %v1038_v23 = vpop.f32.mrb[5].mxu0  ;;  %v536_v33 = vrot.slane %v1386_v21, %v535_v30  ;;  %v434_v34 = vrot.slane %v1386_v21, %v433_v31  ;;  %v641_v55 = vrot.slane %v1386_v21, %v640_v46 }
 0x1d1   : > { %635 = vperm.xlu1 %1119, %v373_v19   ;;  %631 = vperm.xlu0 %1118, %v370_v17   ;;  %v418_v24 = vpop.f32.mrb[6].mxu0  ;;  %v745_v9 = vrot.slane %v1386_v21, %v744_v60 }
 0x1d2   : > { %v1039_v25 = vpop.f32.mrb[7].mxu0 }
 0x1d5   : > { %1120 = vset.pattern.permute.xlu1 %v1243_v26  ;;  %1121 = vset.pattern.permute.xlu0 %v1243_v26 }
 0x1d6   : > { %735 = vperm.xlu1 %1120, %v370_v17   ;;  %739 = vperm.xlu0 %1121, %v373_v19  }
 0x247   : > { %v527_v37 = vpop.permute.xlu1 %526  ;;  %v424_v38 = vpop.permute.xlu0 %423 }
 0x248   : > { %v537_v39 = vadd.f32 %v536_v33, %v527_v37  ;;  %v435_v40 = vadd.f32 %v434_v34, %v424_v38 }
 0x24a   : > { %v541_v42 = vmul.f32 0.2, %v537_v39  ;;  %v439_v43 = vmul.f32 0.2, %v435_v40  ;;  %vm437_vm3 = vcmp.gt.f32.partialorder %v435_v40, 0.0  ;;  %vm539_vm4 = vcmp.gt.f32.partialorder %v537_v39, 0.0 }
 0x24b   : > { %v531_v44 = vpop.permute.xlu1 %530  ;;  %v429_v45 = vpop.permute.xlu0 %428 }
 0x24c   : > { %v538_v47 = vadd.f32 %v536_v33, %v531_v44  ;;  %v436_v48 = vadd.f32 %v434_v34, %v429_v45  ;;  %v441_v49 = vsel %vm437_vm3, %v435_v40, %v439_v43  ;;  %v543_v50 = vsel %vm539_vm4, %v537_v39, %v541_v42 }
 0x24d   : > { %v443_v51 = vsel %vm252_vm2, %v441_v49, -9e+15  ;;  %v545_v56 = vsel %vm252_vm2, %v543_v50, -9e+15  ;;  %vm862_vm4 = vcmask 64512  }
 0x24e   : > { %v542_v52 = vmul.f32 0.2, %v538_v47  ;;  %v440_v53 = vmul.f32 0.2, %v436_v48  ;;  %v446_v54 = vsel %vm445_vm5, %v443_v51, -inf  ;;  %vm438_vm7 = vcmp.gt.f32.partialorder %v436_v48, 0.0 }
 0x24f   : > { %447 = vmax.xlane.f32.xlu1 %v446_v54  ;;  %vm540_vm8 = vcmp.gt.f32.partialorder %v538_v47, 0.0  ;;  %v547_v3 = vsel %vm445_vm5, %v545_v56, -inf }
 0x250   : > { %v636_v57 = vpop.permute.xlu1 %635  ;;  %v632_v58 = vpop.permute.xlu0 %631  ;;  %v442_v59 = vsel %vm438_vm7, %v436_v48, %v440_v53  ;;  %v544_v61 = vsel %vm540_vm8, %v538_v47, %v542_v52  ;;  %vm867_vm7 = vcmask 195584  }
 0x251   : > { %v643_v62 = vadd.f32 %v641_v55, %v636_v57  ;;  %v642_v63 = vadd.f32 %v641_v55, %v632_v58  ;;  %v444_v0 = vsel %vm253_vm6, %v442_v59, -9e+15  ;;  %v546_v6 = vsel %vm253_vm6, %v544_v61, -9e+15 }
 0x252   : > { %v449_v2 = vsel %vm445_vm5, %v444_v0, -inf  ;;  %v550_v17 = vsel %vm445_vm5, %v546_v6, -inf }
 0x253   : > { %v647_v7 = vmul.f32 0.2, %v643_v62  ;;  %v646_v8 = vmul.f32 0.2, %v642_v63  ;;  %450 = vmax.xlane.f32.xlu0 %v449_v2  ;;  %548 = vmax.xlane.f32.xlu1 %v547_v3  ;;  %vm644_vm9 = vcmp.gt.f32.partialorder %v642_v63, 0.0  ;;  %vm645_vm10 = vcmp.gt.f32.partialorder %v643_v62, 0.0 }
 0x255   : > { %v736_v10 = vpop.permute.xlu1 %735  ;;  %v740_v11 = vpop.permute.xlu0 %739  ;;  %v648_v12 = vsel %vm644_vm9, %v642_v63, %v646_v8  ;;  %v649_v14 = vsel %vm645_vm10, %v643_v62, %v647_v7 }
 0x256   : > { %v746_v15 = vadd.f32 %v745_v9, %v736_v10  ;;  %v747_v16 = vadd.f32 %v745_v9, %v740_v11  ;;  %v650_v18 = vsel %vm252_vm2, %v648_v12, -9e+15  ;;  %v651_v20 = vsel %vm253_vm6, %v649_v14, -9e+15 }
 0x257   : > { %551 = vmax.xlane.f32.xlu0 %v550_v17  ;;  %v652_v19 = vsel %vm445_vm5, %v650_v18, -inf  ;;  %v655_v21 = vsel %vm445_vm5, %v651_v20, -inf }
 0x258   : > { %v750_v22 = vmul.f32 0.2, %v746_v15  ;;  %v751_v23 = vmul.f32 0.2, %v747_v16  ;;  %653 = vmax.xlane.f32.xlu1 %v652_v19  ;;  %vm748_vm11 = vcmp.gt.f32.partialorder %v746_v15, 0.0  ;;  %vm749_vm12 = vcmp.gt.f32.partialorder %v747_v16, 0.0 }
 0x25a   : > { %v752_v24 = vsel %vm748_vm11, %v746_v15, %v750_v22  ;;  %v753_v25 = vsel %vm749_vm12, %v747_v16, %v751_v23 }
 0x25b   : > { %656 = vmax.xlane.f32.xlu0 %v655_v21  ;;  %v754_v26 = vsel %vm252_vm2, %v752_v24, -9e+15  ;;  %v755_v27 = vsel %vm253_vm6, %v753_v25, -9e+15 }
 0x25c   : > { %v756_v28 = vsel %vm445_vm5, %v754_v26, -inf  ;;  %v759_v29 = vsel %vm445_vm5, %v755_v27, -inf }
 0x25d   : > { %757 = vmax.xlane.f32.xlu1 %v756_v28 }
 0x25f   : > { %760 = vmax.xlane.f32.xlu0 %v759_v29 }
 0x26e   : > { %571 = vrot.lane.b32.xlu1 %v1369_v13, %s1244_s8  ;;  %s1178_s8 = sshll.u32 %s1250_s7, 4  ;;  %s1179_s8 = int_to_ptr.vmem [resolvable:$false] %s1178_s8 }
 0x26f   : > { %p1181_p0 = scmp.lt.s32.totalorder %s1472_s23, %s1179_s8 }
 0x2dc   : > { %v448_v30 = vpop.xlane.xlu1 %447 }
 0x2dd   : > { %v452_v31 = vsub.f32 %v443_v51, %v448_v30 }
 0x2df   : > { %v454_v32 = vmul.f32 1.442695, %v452_v31 }
 0x2e0   : > { %v451_v33 = vpop.xlane.xlu0 %450  ;;  %v549_v34 = vpop.xlane.xlu1 %548 }
 0x2e1   : > { %1126 = vpow2.f32 %v454_v32  ;;  %v453_v35 = vsub.f32 %v444_v0, %v451_v33  ;;  %v553_v36 = vsub.f32 %v545_v56, %v549_v34 }
 0x2e3   : > { %v456_v37 = vmul.f32 1.442695, %v453_v35  ;;  %v555_v38 = vmul.f32 1.442695, %v553_v36 }
 0x2e4   : > { %v552_v39 = vpop.xlane.xlu0 %551 }
 0x2e5   : > { %1128 = vpow2.f32 %v456_v37  ;;  %v554_v40 = vsub.f32 %v546_v6, %v552_v39  ;;  %v654_v41 = vpop.xlane.xlu1 %653 }
 0x2e6   : > { %1130 = vpow2.f32 %v555_v38  ;;  %v658_v42 = vsub.f32 %v650_v18, %v654_v41 }
 0x2e7   : > { %v557_v43 = vmul.f32 1.442695, %v554_v40 }
 0x2e8   : > { %v660_v44 = vmul.f32 1.442695, %v658_v42  ;;  %v657_v45 = vpop.xlane.xlu0 %656 }
 0x2e9   : > { %1132 = vpow2.f32 %v557_v43  ;;  %v659_v46 = vsub.f32 %v651_v20, %v657_v45 }
 0x2ea   : > { %1134 = vpow2.f32 %v660_v44  ;;  %v758_v47 = vpop.xlane.xlu1 %757 }
 0x2eb   : > { %v1127_v48 = vpop.eup %1126  ;;  %v662_v49 = vmul.f32 1.442695, %v659_v46  ;;  %v762_v50 = vsub.f32 %v754_v26, %v758_v47 }
 0x2ec   : > { %v761_v51 = vpop.xlane.xlu0 %760  ;;  %v458_v52 = vsel %vm445_vm5, %v1127_v48, 0.0 }
 0x2ed   : > { %1136 = vpow2.f32 %v662_v49  ;;  %v764_v53 = vmul.f32 1.442695, %v762_v50  ;;  %v763_v54 = vsub.f32 %v755_v27, %v761_v51  ;;  %459 = vadd.xlane.f32.xlu1 %v458_v52 }
 0x2ee   : > { %v572_v55 = vpop.permute.xlu1 %571 }
 0x2ef   : > { %v1129_v56 = vpop.eup %1128  ;;  %1138 = vpow2.f32 %v764_v53  ;;  %v766_v57 = vmul.f32 1.442695, %v763_v54  ;;  %1047 = vmatpush3.bf16.msra.mxu0 %v572_v55 }
 0x2f0   : > { %v1131_v58 = vpop.eup %1130  ;;  %v461_v59 = vsel %vm445_vm5, %v1129_v56, 0.0  ;;  %1058 = vmatprep.subr.bf16.mxu0 %v1238_v1 }
 0x2f1   : > { %1140 = vpow2.f32 %v766_v57  ;;  %462 = vadd.xlane.f32.xlu0 %v461_v59  ;;  %v559_v60 = vsel %vm445_vm5, %v1131_v58, 0.0 }
 0x2f2   : > { %560 = vadd.xlane.f32.xlu1 %v559_v60 }
 0x2f3   : > { %v1133_v61 = vpop.eup %1132 }
 0x2f4   : > { %v1135_v62 = vpop.eup %1134  ;;  %v562_v63 = vsel %vm445_vm5, %v1133_v61, 0.0 }
 0x2f5   : > { %563 = vadd.xlane.f32.xlu0 %v562_v63  ;;  %v664_v0 = vsel %vm445_vm5, %v1135_v62, 0.0 }
 0x2f6   : > { %665 = vadd.xlane.f32.xlu1 %v664_v0 }
 0x2f7   : > { %v1137_v2 = vpop.eup %1136 }
 0x2f8   : > { %v667_v3 = vsel %vm445_vm5, %v1137_v2, 0.0 }
 0x2f9   : > { %v1139_v6 = vpop.eup %1138  ;;  %668 = vadd.xlane.f32.xlu0 %v667_v3 }
 0x2fa   : > { %v768_v7 = vsel %vm445_vm5, %v1139_v6, 0.0 }
 0x2fb   : > { %v1141_v8 = vpop.eup %1140  ;;  %769 = vadd.xlane.f32.xlu1 %v768_v7 }
 0x2fc   : > { %v771_v9 = vsel %vm445_vm5, %v1141_v8, 0.0 }
 0x2fd   : > { %772 = vadd.xlane.f32.xlu0 %v771_v9 }
 0x30c   : > { %779 = vrot.lane.b32.xlu1 %v1369_v13, %s1245_s9  ;;  %s1180_s9 = scalar_lea.vmem %s1179_s8, 512 }
 0x30d   : > { %p1182_p1 = scmp.lt.s32.totalorder %s1180_s9, %s1174_s6 }
 0x30f   : > { %p1183_p2 = por %p1182_p1, %p1181_p0 }
 0x311   : > { %p1184_p3 = pnand %p1183_p2, %p1177_p13 }
 0x313   : > { %675 = vrot.lane.b32.xlu0 %v1369_v13, %s1246_s10 }
 0x37a   : > { %v460_v10 = vpop.xlane.xlu1 %459 }
 0x37b   : > { %1142 = vrcp.f32 %v460_v10 }
 0x37e   : > { %v463_v11 = vpop.xlane.xlu0 %462 }
 0x37f   : > { %1144 = vrcp.f32 %v463_v11  ;;  %v561_v12 = vpop.xlane.xlu1 %560 }
 0x380   : > { %1146 = vrcp.f32 %v561_v12 }
 0x382   : > { %v564_v14 = vpop.xlane.xlu0 %563 }
 0x383   : > { %1148 = vrcp.f32 %v564_v14  ;;  %v666_v15 = vpop.xlane.xlu1 %665 }
 0x384   : > { %1150 = vrcp.f32 %v666_v15 }
 0x385   : > { %v1143_v17 = vpop.eup %1142 }
 0x386   : > { %v669_v16 = vpop.xlane.xlu0 %668  ;;  %v466_v20 = vmul.f32 %v1143_v17, %v1127_v48 }
 0x387   : > { %1152 = vrcp.f32 %v669_v16 }
 0x388   : > { %v770_v18 = vpop.xlane.xlu1 %769 }
 0x389   : > { %v1145_v19 = vpop.eup %1144  ;;  %1154 = vrcp.f32 %v770_v18 }
 0x38a   : > { %v467_v22 = vmul.f32 %v1145_v19, %v1129_v56  ;;  %v773_v23 = vpop.xlane.xlu0 %772  ;;  %v1147_v13 = vpop.eup %1146 }
 0x38b   : > { %1156 = vrcp.f32 %v773_v23  ;;  %v567_v25 = vmul.f32 %v1147_v13, %v1131_v58 }
 0x38c   : > { %v468_v21 = vpack.c.bf16 %v467_v22, %v466_v20  ;;  %v780_v33 = vpop.permute.xlu1 %779 }
 0x38d   : > { %v1149_v24 = vpop.eup %1148 }
 0x38e   : > { %v568_v26 = vmul.f32 %v1149_v24, %v1133_v61  ;;  %v676_v27 = vpop.permute.xlu0 %675  ;;  %1043 = vmatmul.mubr.msk.bf16.vlgmr.msra.gmra.mrb[4].mxu1 %vm445_vm5, %v468_v21  ;;  %v1151_v28 = vpop.eup %1150 }
 0x38f   : > { %1053 = vmatpush3.bf16.msra.mxu1 %v676_v27  ;;  %1054 = vmatprep.mubr.msk.bf16.mxu1 %vm1239_vm0, %v1238_v1  ;;  %v672_v31 = vmul.f32 %v1151_v28, %v1135_v62 }
 0x390   : > { %v569_v29 = vpack.c.bf16 %v568_v26, %v567_v25 }
 0x391   : > { %v1153_v30 = vpop.eup %1152 }
 0x392   : > { %v673_v32 = vmul.f32 %v1153_v30, %v1137_v2  ;;  %1049 = vmatmul.mubr.msk.bf16.vlgmr.msra.gmra.mrb[8].mxu0 %vm445_vm5, %v569_v29 }
 0x393   : > { %v1155_v34 = vpop.eup %1154  ;;  %1059 = vmatpush3.bf16.msra.mxu0 %v780_v33  ;;  %1060 = vmatprep.mubr.msk.bf16.mxu0 %vm1239_vm0, %v1238_v1 }
 0x394   : > { %v674_v35 = vpack.c.bf16 %v673_v32, %v672_v31  ;;  %v776_v37 = vmul.f32 %v1155_v34, %v1139_v6 }
 0x395   : > { %v1157_v36 = vpop.eup %1156 }
 0x396   : > { %v777_v38 = vmul.f32 %v1157_v36, %v1141_v8  ;;  %1055 = vmatmul.mubr.msk.bf16.vlgmr.msra.gmra.mrb[8].mxu1 %vm445_vm5, %v674_v35 }
 0x398   : > { %v778_v39 = vpack.c.bf16 %v777_v38, %v776_v37 }
 0x39a   : > { %1061 = vmatmul.mubr.msk.bf16.vlgmr.msra.gmra.mrb[12].mxu0 %vm445_vm5, %v778_v39 }
 0x461   : > { %v1446_v40 = vpop.f32.mrb[4].mxu1 }
 0x462   : > { %v1044_v41 = vpop.f32.mrb[5].mxu1  ;;  %v515_v24 = vmin.f32 %v1446_v40, 0.0  ;;  %vm513_vm6 = vcmp.gt.f32.partialorder %v1446_v40, 0.0 }
 0x463   : > { %v1448_v42 = vpop.f32.mrb[6].mxu1 }
 0x464   : > { %v1045_v43 = vpop.f32.mrb[7].mxu1  ;;  %v516_v25 = vmin.f32 %v1448_v42, 0.0  ;;  %v517_v26 = vmul.f32 1.442695, %v515_v24  ;;  %vm514_vm8 = vcmp.gt.f32.partialorder %v1448_v42, 0.0 }
 0x465   : > { %v611_v44 = vpop.f32.mrb[8].mxu0 }
 0x466   : > { %v620_v45 = vmin.f32 %v611_v44, 0.0  ;;  %v1050_v46 = vpop.f32.mrb[9].mxu0  ;;  %vm618_vm13 = vcmp.gt.f32.partialorder %v611_v44, 0.0  ;;  %v519_v27 = vmul.f32 1.442695, %v516_v25 }
 0x467   : > { %v614_v47 = vpop.f32.mrb[10].mxu0 }
 0x468   : > { %v622_v1 = vmul.f32 1.442695, %v620_v45  ;;  %v621_v48 = vmin.f32 %v614_v47, 0.0  ;;  %v1051_v49 = vpop.f32.mrb[11].mxu0  ;;  %vm619_vm14 = vcmp.gt.f32.partialorder %v614_v47, 0.0 }
 0x469   : > { %v715_v50 = vpop.f32.mrb[8].mxu1 }
 0x46a   : > { %1158 = vpow2.f32 %v622_v1  ;;  %v624_v51 = vmul.f32 1.442695, %v621_v48  ;;  %v724_v52 = vmin.f32 %v715_v50, 0.0  ;;  %v1056_v53 = vpop.f32.mrb[9].mxu1  ;;  %vm722_vm15 = vcmp.gt.f32.partialorder %v715_v50, 0.0 }
 0x46b   : > { %v718_v54 = vpop.f32.mrb[10].mxu1 }
 0x46c   : > { %1160 = vpow2.f32 %v624_v51  ;;  %v726_v55 = vmul.f32 1.442695, %v724_v52  ;;  %v725_v56 = vmin.f32 %v718_v54, 0.0  ;;  %v1057_v57 = vpop.f32.mrb[11].mxu1  ;;  %vm723_vm0 = vcmp.gt.f32.partialorder %v718_v54, 0.0 }
 0x46d   : > { %v819_v58 = vpop.f32.mrb[12].mxu0 }
 0x46e   : > { %1162 = vpow2.f32 %v726_v55  ;;  %v728_v59 = vmul.f32 1.442695, %v725_v56  ;;  %v828_v60 = vmin.f32 %v819_v58, 0.0  ;;  %v1062_v61 = vpop.f32.mrb[13].mxu0  ;;  %vm826_vm2 = vcmp.gt.f32.partialorder %v819_v58, 0.0 }
 0x46f   : > { %v822_v62 = vpop.f32.mrb[14].mxu0 }
 0x470   : > { %1164 = vpow2.f32 %v728_v59  ;;  %v830_v63 = vmul.f32 1.442695, %v828_v60  ;;  %v829_v0 = vmin.f32 %v822_v62, 0.0  ;;  %v1063_v2 = vpop.f32.mrb[15].mxu0  ;;  %vm827_vm3 = vcmp.gt.f32.partialorder %v822_v62, 0.0 }
 0x472   : > { %1166 = vpow2.f32 %v830_v63  ;;  %v832_v3 = vmul.f32 1.442695, %v829_v0 }
 0x474   : > { %v1159_v6 = vpop.eup %1158  ;;  %1168 = vpow2.f32 %v832_v3 }
 0x475   : > { %v982_v7 = vadd.f32 -1.0, %v1159_v6  ;;  %1170 = vpow2.f32 %v517_v26 }
 0x476   : > { %v1161_v8 = vpop.eup %1160  ;;  %1172 = vpow2.f32 %v519_v27 }
 0x477   : > { %v628_v9 = vsel %vm618_vm13, %v611_v44, %v982_v7  ;;  %v983_v10 = vadd.f32 -1.0, %v1161_v8 }
 0x478   : > { %v1163_v11 = vpop.eup %1162  ;;  %840 = vrot.lane.b32.xlu1 %v628_v9, %s1247_s11 }
 0x479   : > { %v629_v12 = vsel %vm619_vm14, %v614_v47, %v983_v10  ;;  %v985_v14 = vadd.f32 -1.0, %v1163_v11 }
 0x47a   : > { %v1165_v15 = vpop.eup %1164  ;;  %842 = vrot.lane.b32.xlu0 %v629_v12, %s1247_s11 }
 0x47b   : > { %v732_v16 = vsel %vm722_vm15, %v715_v50, %v985_v14  ;;  %v986_v17 = vadd.f32 -1.0, %v1165_v15 }
 0x47c   : > { %v1167_v18 = vpop.eup %1166  ;;  %848 = vrot.lane.b32.xlu1 %v732_v16, %s1248_s12 }
 0x47d   : > { %v733_v19 = vsel %vm723_vm0, %v718_v54, %v986_v17  ;;  %v988_v20 = vadd.f32 -1.0, %v1167_v18 }
 0x47e   : > { %v1169_v22 = vpop.eup %1168  ;;  %850 = vrot.lane.b32.xlu0 %v733_v19, %s1248_s12 }
 0x47f   : > { %v836_v23 = vsel %vm826_vm2, %v819_v58, %v988_v20  ;;  %v989_v13 = vadd.f32 -1.0, %v1169_v22  ;;  %v1171_v28 = vpop.eup %1170 }
 0x480   : > { %856 = vrot.lane.b32.xlu1 %v836_v23, %s1249_s13  ;;  %v1173_v30 = vpop.eup %1172  ;;  %v979_v31 = vadd.f32 -1.0, %v1171_v28 }
 0x481   : > { %v837_v21 = vsel %vm827_vm3, %v822_v62, %v989_v13  ;;  %v980_v33 = vadd.f32 -1.0, %v1173_v30 }
 0x482   : > { %858 = vrot.lane.b32.xlu0 %v837_v21, %s1249_s13  ;;  %v523_v35 = vsel %vm513_vm6, %v1446_v40, %v979_v31 }
 0x483   : > { %v524_v38 = vsel %vm514_vm8, %v1448_v42, %v980_v33 }
 0x4ea   : > { %v841_v29 = vpop.permute.xlu1 %840 }
 0x4eb   : > { %v863_v37 = vsel %vm862_vm4, %v523_v35, %v841_v29 }
 0x4ec   : > { %v843_v32 = vpop.permute.xlu0 %842 }
 0x4ed   : > { %v864_v43 = vsel %vm862_vm4, %v524_v38, %v843_v32 }
 0x4ee   : > { %v849_v34 = vpop.permute.xlu1 %848 }
 0x4ef   : > { %v865_v39 = vsel %vm445_vm5, %v863_v37, %v849_v34 }
 0x4f0   : > { %v851_v36 = vpop.permute.xlu0 %850 }
 0x4f1   : > { %v866_v45 = vsel %vm445_vm5, %v864_v43, %v851_v36 }
 0x4f2   : > { %v857_v41 = vpop.permute.xlu1 %856 }
 0x4f3   : > { %v868_v44 = vsel %vm867_vm7, %v865_v39, %v857_v41 }
 0x4f4   : > { %v870_v40 = vadd.f32 %v868_v44, %v1356_v4  ;;  %v859_v46 = vpop.permute.xlu0 %858 }
 0x4f5   : > { %v869_v47 = vsel %vm867_vm7, %v866_v45, %v859_v46 }
 0x4f6   : > { %872 = vst.msk [vmem:[%s232_s17] sm:$0xff] %vm271_vm1, %v870_v40  ;;  %v871_v42 = vadd.f32 %v869_v47, %v1358_v5 }
 0x4f8   : > { %873 = vst.msk [vmem:[%s232_s17 + $0x8] sm:$0xff] %vm271_vm1, %v871_v42 }
 0x4f9   : > { %1187 = shalt.err (!%p1184_p3)
}
 0x4fa   : > { %s1188_s10 = scalar_lea.hbm %s1468_s30, 256  ;;  %s1192_s14 = scalar_lea.hbm %s1524_s5, 512 }
 0x4fb   : > { %p1189_p4 = scmp.ne.s32.totalorder %s1468_s30, %s1188_s10  ;;  %p1193_p9 = scmp.lt.u32.totalorder %s1468_s30, %s1524_s5 }
 0x4fc   : > { %p1194_p10 = scmp.lt.u32.totalorder %s1192_s14, %s1188_s10  ;;  %p1196_p12 = scmp.lt.u32.totalorder %s1188_s10, %s1468_s30 }
 0x4fd   : > { %p1190_p7 = pnand %p1189_p4, %p1320_p5 }
 0x4fe   : > { %p1195_p11 = por %p1194_p10, %p1193_p9 }
 0x4ff   : > { %p1191_p8 = pneg %p1190_p7 }
 0x500   : > { %p1197_p13 = por %p1196_p12, %p1195_p11 }
 0x502   : > { %p1198_p0 = pnand %p1197_p13, %p1191_p8 }
 0x504   : > { %1201 = shalt.err (!%p1198_p0)
}
 0x505   : > { %s1251_s17 = smov 128  }
 0x506   : > { %1064 = dma.vmem_to_hbm [thread:$0]  (%p1320_p5), %s1472_s23, 256, %s1468_s30, %s1477_s22, %s1251_s17, %s1251_s17, %s1247_s11  }
 0x507 PF: > { %p1070_p1 = scmp.ge.s32.totalorder %s1236_s21, 2  ;;  %s903_s25 = sand.u32 1, %s1224_s18  }
 0x508   : > { %s904_s26 = scalar_lea.sflag [#allocation3], %s903_s25 }
 0x509   : > { %p1067_p2 = pnand %p1070_p1, %p1324_p6 }
 0x50b   : > { %1219 = dma.done.wait (!%p1067_p2), %s904_s26, 256  }
 0x50c   : > { %1221 = vsyncadd (!%p1067_p2), %s904_s26, 4294967040  ;;  %p15_p3 = scmp.ge.s32.totalorder %s1307_s24, 4   ;;  %s1527_s18 = smov %s1228_s19 }
 0x50d   : > { %s1528_s19 = smov %s1232_s20  ;;  %s1529_s20 = smov %s1318_s27 }
 0x50e   : > { %s1530_s21 = smov %s1307_s24  ;;  %17 = sbr.rel (!%p15_p3) target bundleno = 3 (0x3), region = 78 }
 0x515   :  { %909 = vsyncpa [#allocation3], 1 }
 0x516   :  { %911 = vsyncpa [#allocation3 + $0x1], 1 }

</bundles_post_ra>
